<compile_context>
chip_gen: v7x
topology: tpu7x:2x2x1
jax: 0.10.0
libtpu: 0.0.40
codegen_flags: <defaults>
</compile_context>

<pallas_src>
import functools

import jax
import jax.numpy as jnp
from jax import lax
from jax.experimental import pallas as pl
from jax.experimental.pallas import tpu as pltpu


def bottleneck_kernel(x_ref, w1_ref, s1_ref, b1_ref,
                      w2_ref, s2_ref, b2_ref,
                      w3_ref, s3_ref, b3_ref,
                      o_ref, *, Nb, H, W, Cin, P, matmul_dtype):
    rows = Nb * H * W

    # ---- conv1 (1x1) + bn1 + relu ---------------------------------------
    x = x_ref[...].reshape(rows, Cin).astype(matmul_dtype)
    h1 = jnp.dot(x, w1_ref[...], preferred_element_type=jnp.float32)
    h1 = jnp.maximum(h1 * s1_ref[...] + b1_ref[...], 0.0)            # (rows, P) f32

    # ---- conv2 (3x3, stride=1, pad=1) -----------------------------------
    # Build the three kx-shifted maps with register-level shifts (no VMEM
    # scratch round trip) and concat them on the lane axis so each ky tap is a
    # single MXU matmul with contraction dim K = 3*P.
    h1m = h1.astype(matmul_dtype).reshape(Nb, H, W, P)
    zcol = jnp.zeros((Nb, H, 1, P), matmul_dtype)
    left = jnp.concatenate([zcol, h1m[:, :, :W - 1, :]], axis=2)      # h1[.., x-1, :]
    right = jnp.concatenate([h1m[:, :, 1:, :], zcol], axis=2)         # h1[.., x+1, :]
    hcat = jnp.concatenate([left, h1m, right], axis=3)                # (Nb, H, W, 3P)

    zrow = jnp.zeros((Nb, 1, W, 3 * P), matmul_dtype)
    win0 = jnp.concatenate([zrow, hcat[:, :H - 1]], axis=1)           # rows at y-1
    win2 = jnp.concatenate([hcat[:, 1:], zrow], axis=1)               # rows at y+1

    # Accumulator initialized by the first tap's matmul (no zeros + extra add).
    acc = jnp.dot(win0.reshape(rows, 3 * P), w2_ref[0],
                  preferred_element_type=jnp.float32)
    acc = acc + jnp.dot(hcat.reshape(rows, 3 * P), w2_ref[1],
                        preferred_element_type=jnp.float32)
    acc = acc + jnp.dot(win2.reshape(rows, 3 * P), w2_ref[2],
                        preferred_element_type=jnp.float32)
    h2 = jnp.maximum(acc * s2_ref[...] + b2_ref[...], 0.0)            # (rows, P) f32

    # ---- conv3 (1x1) + bn3 -----------------------------------------------
    h3 = jnp.dot(h2.astype(matmul_dtype), w3_ref[...],
                 preferred_element_type=jnp.float32)
    h3 = h3 * s3_ref[...] + b3_ref[...]                               # (rows, 4P)

    # ---- residual (identity, downsample is None) + relu -------------------
    # Re-read x from the resident input block here instead of keeping the
    # value live across all three matmuls (reduces vreg pressure / spills).
    res = x_ref[...].reshape(rows, Cin).astype(jnp.float32)
    out = jnp.maximum(h3 + res, 0.0)
    o_ref[...] = out.reshape(Nb, H, W, Cin).astype(o_ref.dtype)


def _pick_block_batch(N, H, W, Cin, P, vmem_budget_bytes=8 * 1024 * 1024):
    """Images per grid step so double-buffered blocks + temps fit the budget."""
    per_img = H * W * (4 * Cin        # 2x double-buffered input + output blocks
                       + Cin          # residual re-read
                       + 8 * P        # h1 + hcat(3P) + shifted windows
                       + 5 * P) * 4   # h2, h3 accumulators            (f32 bytes)
    nb = max(1, min(N, vmem_budget_bytes // max(per_img, 1)))
    # Keep the parallel grid axis length >= 2 when possible (v7x: 2 TensorCores).
    while nb > 1 and pl.cdiv(N, nb) < 2:
        nb -= 1
    while N % nb:
        nb -= 1
    return nb, per_img


def bottleneck_forward(x_nhwc, params, *, matmul_dtype=jnp.float32):
    """x_nhwc: (N, H, W, Cin) with Cin == 4*planes (stride=1, downsample=None)."""
    N, H, W, Cin = x_nhwc.shape
    P = params["w1"].shape[1]
    assert Cin == 4 * P, "identity residual requires inplanes == 4*planes"

    Nb, per_img = _pick_block_batch(N, H, W, Cin, P)

    # w2 is HWIO (3,3,P,P); fold kx into the contraction dim once on the host
    # so each ky tap is a single (3P, P) MXU operand.
    w1c = params["w1"].astype(matmul_dtype)
    w2c = params["w2"].reshape(3, 3 * P, P).astype(matmul_dtype)
    w3c = params["w3"].astype(matmul_dtype)

    # Explicit VMEM budget, sized to also fit v7x's 64 MiB/TC VMEM.
    itemsize = jnp.dtype(matmul_dtype).itemsize
    weight_bytes = (w1c.size + w2c.size + w3c.size) * itemsize
    vmem_limit = int(min(48 * 1024 * 1024,
                         max(16 * 1024 * 1024, 2 * (Nb * per_img + weight_bytes))))

    full = lambda a: pl.BlockSpec(a.shape, lambda n: (0,) * a.ndim)
    kernel = functools.partial(bottleneck_kernel, Nb=Nb, H=H, W=W, Cin=Cin, P=P,
                               matmul_dtype=matmul_dtype)

    return pl.pallas_call(
        kernel,
        out_shape=jax.ShapeDtypeStruct((N, H, W, Cin), x_nhwc.dtype),
        grid_spec=pltpu.PrefetchScalarGridSpec(
            num_scalar_prefetch=0,
            grid=(N // Nb,),
            in_specs=[
                pl.BlockSpec((Nb, H, W, Cin), lambda n: (n, 0, 0, 0)),
                full(w1c), full(params["s1"]), full(params["b1"]),
                full(w2c), full(params["s2"]), full(params["b2"]),
                full(w3c), full(params["s3"]), full(params["b3"]),
            ],
            out_specs=pl.BlockSpec((Nb, H, W, Cin), lambda n: (n, 0, 0, 0)),
        ),
        compiler_params=pltpu.CompilerParams(
            dimension_semantics=("parallel",),
            vmem_limit_bytes=vmem_limit),
    )(x_nhwc,
      w1c, params["s1"], params["b1"],
      w2c, params["s2"], params["b2"],
      w3c, params["s3"], params["b3"])


def make_params(key, inplanes, planes, eps=1e-5):
    """Deterministic synthetic parameters (BN folded to scale/bias)."""
    ks = jax.random.split(key, 12)
    cout = planes * 4

    def bn_fold(kg, kb, km, kv, c):
        gamma = 1.0 + 0.1 * jax.random.normal(kg, (c,), jnp.float32)
        beta = 0.1 * jax.random.normal(kb, (c,), jnp.float32)
        rmean = 0.1 * jax.random.normal(km, (c,), jnp.float32)
        rvar = jnp.abs(jax.random.normal(kv, (c,), jnp.float32)) + 0.5
        scale = gamma / jnp.sqrt(rvar + eps)
        bias = beta - rmean * scale
        return scale.reshape(1, c), bias.reshape(1, c)

    # conv weights stored for NHWC matmul form:
    #   w1: (Cin, P)      <- PyTorch (P, Cin, 1, 1)
    #   w2: (3, 3, P, P)  HWIO <- PyTorch (P, P, 3, 3)
    #   w3: (P, Cout)     <- PyTorch (Cout, P, 1, 1)
    w1 = 0.1 * jax.random.normal(ks[0], (inplanes, planes), jnp.float32)
    w2 = 0.1 * jax.random.normal(ks[1], (3, 3, planes, planes), jnp.float32)
    w3 = 0.1 * jax.random.normal(ks[2], (planes, cout), jnp.float32)

    s1, b1 = bn_fold(ks[3], ks[4], ks[5], ks[6], planes)
    s2, b2 = bn_fold(ks[7], ks[8], ks[9], ks[10], planes)
    s3, b3 = bn_fold(ks[11], ks[3], ks[5], ks[7], cout)  # key reuse, still deterministic

    return dict(w1=w1, s1=s1, b1=b1, w2=w2, s2=s2, b2=b2, w3=w3, s3=s3, b3=b3)


def bottleneck_reference(x_nhwc, p):
    """Plain-JAX reference (NHWC) for validation."""
    dn = ("NHWC", "HWIO", "NHWC")
    h = jnp.einsum("nhwc,cp->nhwp", x_nhwc, p["w1"], precision="highest")
    h = jnp.maximum(h * p["s1"][0] + p["b1"][0], 0.0)
    h = lax.conv_general_dilated(h, p["w2"], window_strides=(1, 1),
                                 padding=((1, 1), (1, 1)),
                                 dimension_numbers=dn,
                                 precision=lax.Precision.HIGHEST)
    h = jnp.maximum(h * p["s2"][0] + p["b2"][0], 0.0)
    h = jnp.einsum("nhwc,cp->nhwp", h, p["w3"], precision="highest")
    h = h * p["s3"][0] + p["b3"][0]
    return jnp.maximum(h + x_nhwc, 0.0)


if __name__ == "__main__":
    # Small but lane-dense shapes: planes=32 -> inplanes = 4*32 = 128, so the
    # output channel (lane) dim is a full 128 lanes (unmasked stores).
    N, H, W = 2, 16, 16
    planes = 32
    inplanes = planes * 4            # identity residual (downsample=None)

    key = jax.random.PRNGKey(0)
    kx, kp = jax.random.split(key)
    # PyTorch input would be NCHW (2, 128, 16, 16); kernel layout is NHWC.
    x_nchw = jax.random.normal(kx, (N, inplanes, H, W), jnp.float32)
    x_nhwc = jnp.transpose(x_nchw, (0, 2, 3, 1))

    params = make_params(kp, inplanes, planes)

    out = bottleneck_forward(x_nhwc, params)
    out = jax.block_until_ready(out)

    ref = bottleneck_reference(x_nhwc, params)
    assert out.shape == (N, H, W, inplanes)
    assert jnp.allclose(out, ref, rtol=1e-3, atol=1e-3), "mismatch vs reference"

    print("KERNEL_OK")
</pallas_src>

<mosaic_0001>
module attributes {stable_mosaic.version = 11 : i64} {
  func.func @bottleneck_kernel(%arg0: i32, %arg1: memref<1x16x16x128xf32, #tpu.memory_space<vmem>>, %arg2: memref<128x32xf32, #tpu.memory_space<vmem>>, %arg3: memref<1x32xf32, #tpu.memory_space<vmem>>, %arg4: memref<1x32xf32, #tpu.memory_space<vmem>>, %arg5: memref<3x96x32xf32, #tpu.memory_space<vmem>>, %arg6: memref<1x32xf32, #tpu.memory_space<vmem>>, %arg7: memref<1x32xf32, #tpu.memory_space<vmem>>, %arg8: memref<32x128xf32, #tpu.memory_space<vmem>>, %arg9: memref<1x128xf32, #tpu.memory_space<vmem>>, %arg10: memref<1x128xf32, #tpu.memory_space<vmem>>, %arg11: memref<1x16x16x128xf32, #tpu.memory_space<vmem>>) attributes {dimension_semantics = [#tpu.dimension_semantics<parallel>], iteration_bounds = array<i64: 2>, scalar_prefetch = 0 : i64, scratch_operands = 0 : i64, tpu.core_type = #tpu.core_type<tc>, window_params = [{transform_indices = @transform_0, window_bounds = array<i64: 1, 16, 16, 128>}, {pipeline_mode = #tpu.pipeline_mode<synchronous>, transform_indices = @transform_1, window_bounds = array<i64: 128, 32>}, {pipeline_mode = #tpu.pipeline_mode<synchronous>, transform_indices = @transform_2, window_bounds = array<i64: 1, 32>}, {pipeline_mode = #tpu.pipeline_mode<synchronous>, transform_indices = @transform_3, window_bounds = array<i64: 1, 32>}, {pipeline_mode = #tpu.pipeline_mode<synchronous>, transform_indices = @transform_4, window_bounds = array<i64: 3, 96, 32>}, {pipeline_mode = #tpu.pipeline_mode<synchronous>, transform_indices = @transform_5, window_bounds = array<i64: 1, 32>}, {pipeline_mode = #tpu.pipeline_mode<synchronous>, transform_indices = @transform_6, window_bounds = array<i64: 1, 32>}, {pipeline_mode = #tpu.pipeline_mode<synchronous>, transform_indices = @transform_7, window_bounds = array<i64: 32, 128>}, {pipeline_mode = #tpu.pipeline_mode<synchronous>, transform_indices = @transform_8, window_bounds = array<i64: 1, 128>}, {pipeline_mode = #tpu.pipeline_mode<synchronous>, transform_indices = @transform_9, window_bounds = array<i64: 1, 128>}, {transform_indices = @transform_10, window_bounds = array<i64: 1, 16, 16, 128>}]} {
    %c0 = arith.constant 0 : index
    %c0_0 = arith.constant 0 : index
    %c0_1 = arith.constant 0 : index
    %c0_2 = arith.constant 0 : index
    %0 = vector.load %arg1[%c0, %c0_0, %c0_1, %c0_2] : memref<1x16x16x128xf32, #tpu.memory_space<vmem>>, vector<1x16x16x128xf32>
    %1 = vector.shape_cast %0 : vector<1x16x16x128xf32> to vector<256x128xf32>
    %c0_3 = arith.constant 0 : index
    %c0_4 = arith.constant 0 : index
    %2 = vector.load %arg2[%c0_3, %c0_4] : memref<128x32xf32, #tpu.memory_space<vmem>>, vector<128x32xf32>
    %cst = arith.constant dense<0.000000e+00> : vector<256x32xf32>
    %3 = tpu.matmul %1, %2, %cst {dimension_numbers = #tpu.dot_dimension_numbers<[1], [0], [0], [1], [0, 0, 1, 1], [], []>} : vector<256x128xf32>, vector<128x32xf32>, vector<256x32xf32> -> vector<256x32xf32>
    %c0_5 = arith.constant 0 : index
    %c0_6 = arith.constant 0 : index
    %4 = vector.load %arg3[%c0_5, %c0_6] : memref<1x32xf32, #tpu.memory_space<vmem>>, vector<1x32xf32>
    %5 = vector.broadcast %4 : vector<1x32xf32> to vector<256x32xf32>
    %6 = arith.mulf %3, %5 : vector<256x32xf32>
    %c0_7 = arith.constant 0 : index
    %c0_8 = arith.constant 0 : index
    %7 = vector.load %arg4[%c0_7, %c0_8] : memref<1x32xf32, #tpu.memory_space<vmem>>, vector<1x32xf32>
    %8 = vector.broadcast %7 : vector<1x32xf32> to vector<256x32xf32>
    %9 = arith.addf %6, %8 : vector<256x32xf32>
    %cst_9 = arith.constant 0.000000e+00 : f32
    %10 = vector.broadcast %cst_9 : f32 to vector<256x32xf32>
    %11 = arith.maximumf %9, %10 : vector<256x32xf32>
    %12 = vector.shape_cast %11 : vector<256x32xf32> to vector<1x16x16x32xf32>
    %cst_10 = arith.constant 0.000000e+00 : f32
    %13 = vector.broadcast %cst_10 : f32 to vector<1x16x1x32xf32>
    %14 = vector.extract_strided_slice %12 {offsets = [0, 0, 0, 0], sizes = [1, 16, 15, 32], strides = [1, 1, 1, 1]} : vector<1x16x16x32xf32> to vector<1x16x15x32xf32>
    %15 = tpu.concatenate %13, %14 in 2 : vector<1x16x1x32xf32>, vector<1x16x15x32xf32> -> vector<1x16x16x32xf32>
    %16 = vector.extract_strided_slice %12 {offsets = [0, 0, 1, 0], sizes = [1, 16, 15, 32], strides = [1, 1, 1, 1]} : vector<1x16x16x32xf32> to vector<1x16x15x32xf32>
    %17 = tpu.concatenate %16, %13 in 2 : vector<1x16x15x32xf32>, vector<1x16x1x32xf32> -> vector<1x16x16x32xf32>
    %18 = tpu.concatenate %15, %12, %17 in 3 : vector<1x16x16x32xf32>, vector<1x16x16x32xf32>, vector<1x16x16x32xf32> -> vector<1x16x16x96xf32>
    %cst_11 = arith.constant 0.000000e+00 : f32
    %19 = vector.broadcast %cst_11 : f32 to vector<1x1x16x96xf32>
    %20 = vector.extract_strided_slice %18 {offsets = [0, 0, 0, 0], sizes = [1, 15, 16, 96], strides = [1, 1, 1, 1]} : vector<1x16x16x96xf32> to vector<1x15x16x96xf32>
    %21 = tpu.concatenate %19, %20 in 1 : vector<1x1x16x96xf32>, vector<1x15x16x96xf32> -> vector<1x16x16x96xf32>
    %22 = vector.extract_strided_slice %18 {offsets = [0, 1, 0, 0], sizes = [1, 15, 16, 96], strides = [1, 1, 1, 1]} : vector<1x16x16x96xf32> to vector<1x15x16x96xf32>
    %23 = tpu.concatenate %22, %19 in 1 : vector<1x15x16x96xf32>, vector<1x1x16x96xf32> -> vector<1x16x16x96xf32>
    %24 = vector.shape_cast %21 : vector<1x16x16x96xf32> to vector<256x96xf32>
    %c0_12 = arith.constant 0 : index
    %c0_13 = arith.constant 0 : index
    %c0_14 = arith.constant 0 : index
    %25 = vector.load %arg5[%c0_12, %c0_13, %c0_14] : memref<3x96x32xf32, #tpu.memory_space<vmem>>, vector<1x96x32xf32>
    %26 = vector.shape_cast %25 : vector<1x96x32xf32> to vector<96x32xf32>
    %cst_15 = arith.constant dense<0.000000e+00> : vector<256x32xf32>
    %27 = tpu.matmul %24, %26, %cst_15 {dimension_numbers = #tpu.dot_dimension_numbers<[1], [0], [0], [1], [0, 0, 1, 1], [], []>} : vector<256x96xf32>, vector<96x32xf32>, vector<256x32xf32> -> vector<256x32xf32>
    %28 = vector.shape_cast %18 : vector<1x16x16x96xf32> to vector<256x96xf32>
    %c1 = arith.constant 1 : index
    %c0_16 = arith.constant 0 : index
    %c0_17 = arith.constant 0 : index
    %29 = vector.load %arg5[%c1, %c0_16, %c0_17] : memref<3x96x32xf32, #tpu.memory_space<vmem>>, vector<1x96x32xf32>
    %30 = vector.shape_cast %29 : vector<1x96x32xf32> to vector<96x32xf32>
    %cst_18 = arith.constant dense<0.000000e+00> : vector<256x32xf32>
    %31 = tpu.matmul %28, %30, %cst_18 {dimension_numbers = #tpu.dot_dimension_numbers<[1], [0], [0], [1], [0, 0, 1, 1], [], []>} : vector<256x96xf32>, vector<96x32xf32>, vector<256x32xf32> -> vector<256x32xf32>
    %32 = arith.addf %27, %31 : vector<256x32xf32>
    %33 = vector.shape_cast %23 : vector<1x16x16x96xf32> to vector<256x96xf32>
    %c2 = arith.constant 2 : index
    %c0_19 = arith.constant 0 : index
    %c0_20 = arith.constant 0 : index
    %34 = vector.load %arg5[%c2, %c0_19, %c0_20] : memref<3x96x32xf32, #tpu.memory_space<vmem>>, vector<1x96x32xf32>
    %35 = vector.shape_cast %34 : vector<1x96x32xf32> to vector<96x32xf32>
    %cst_21 = arith.constant dense<0.000000e+00> : vector<256x32xf32>
    %36 = tpu.matmul %33, %35, %cst_21 {dimension_numbers = #tpu.dot_dimension_numbers<[1], [0], [0], [1], [0, 0, 1, 1], [], []>} : vector<256x96xf32>, vector<96x32xf32>, vector<256x32xf32> -> vector<256x32xf32>
    %37 = arith.addf %32, %36 : vector<256x32xf32>
    %c0_22 = arith.constant 0 : index
    %c0_23 = arith.constant 0 : index
    %38 = vector.load %arg6[%c0_22, %c0_23] : memref<1x32xf32, #tpu.memory_space<vmem>>, vector<1x32xf32>
    %39 = vector.broadcast %38 : vector<1x32xf32> to vector<256x32xf32>
    %40 = arith.mulf %37, %39 : vector<256x32xf32>
    %c0_24 = arith.constant 0 : index
    %c0_25 = arith.constant 0 : index
    %41 = vector.load %arg7[%c0_24, %c0_25] : memref<1x32xf32, #tpu.memory_space<vmem>>, vector<1x32xf32>
    %42 = vector.broadcast %41 : vector<1x32xf32> to vector<256x32xf32>
    %43 = arith.addf %40, %42 : vector<256x32xf32>
    %cst_26 = arith.constant 0.000000e+00 : f32
    %44 = vector.broadcast %cst_26 : f32 to vector<256x32xf32>
    %45 = arith.maximumf %43, %44 : vector<256x32xf32>
    %c0_27 = arith.constant 0 : index
    %c0_28 = arith.constant 0 : index
    %46 = vector.load %arg8[%c0_27, %c0_28] : memref<32x128xf32, #tpu.memory_space<vmem>>, vector<32x128xf32>
    %cst_29 = arith.constant dense<0.000000e+00> : vector<256x128xf32>
    %47 = tpu.matmul %45, %46, %cst_29 {dimension_numbers = #tpu.dot_dimension_numbers<[1], [0], [0], [1], [0, 0, 1, 1], [], []>} : vector<256x32xf32>, vector<32x128xf32>, vector<256x128xf32> -> vector<256x128xf32>
    %c0_30 = arith.constant 0 : index
    %c0_31 = arith.constant 0 : index
    %48 = vector.load %arg9[%c0_30, %c0_31] : memref<1x128xf32, #tpu.memory_space<vmem>>, vector<1x128xf32>
    %49 = vector.broadcast %48 : vector<1x128xf32> to vector<256x128xf32>
    %50 = arith.mulf %47, %49 : vector<256x128xf32>
    %c0_32 = arith.constant 0 : index
    %c0_33 = arith.constant 0 : index
    %51 = vector.load %arg10[%c0_32, %c0_33] : memref<1x128xf32, #tpu.memory_space<vmem>>, vector<1x128xf32>
    %52 = vector.broadcast %51 : vector<1x128xf32> to vector<256x128xf32>
    %53 = arith.addf %50, %52 : vector<256x128xf32>
    %c0_34 = arith.constant 0 : index
    %c0_35 = arith.constant 0 : index
    %c0_36 = arith.constant 0 : index
    %c0_37 = arith.constant 0 : index
    %54 = vector.load %arg1[%c0_34, %c0_35, %c0_36, %c0_37] : memref<1x16x16x128xf32, #tpu.memory_space<vmem>>, vector<1x16x16x128xf32>
    %55 = vector.shape_cast %54 : vector<1x16x16x128xf32> to vector<256x128xf32>
    %56 = arith.addf %53, %55 : vector<256x128xf32>
    %cst_38 = arith.constant 0.000000e+00 : f32
    %57 = vector.broadcast %cst_38 : f32 to vector<256x128xf32>
    %58 = arith.maximumf %56, %57 : vector<256x128xf32>
    %59 = vector.shape_cast %58 : vector<256x128xf32> to vector<1x16x16x128xf32>
    %c0_39 = arith.constant 0 : index
    %c0_40 = arith.constant 0 : index
    %c0_41 = arith.constant 0 : index
    %c0_42 = arith.constant 0 : index
    %60 = vector.load %arg11[%c0_39, %c0_40, %c0_41, %c0_42] : memref<1x16x16x128xf32, #tpu.memory_space<vmem>>, vector<1x16x16x128xf32>
    tpu.vector_store %arg11[%c0_39, %c0_40, %c0_41, %c0_42], %59 {strides = array<i32>} : memref<1x16x16x128xf32, #tpu.memory_space<vmem>>, vector<1x16x16x128xf32>,
    return
  }
  func.func @transform_0(%arg0: i32) -> (i32, i32, i32, i32) {
    %c0_i32 = arith.constant 0 : i32
    %c0_i32_0 = arith.constant 0 : i32
    %c0_i32_1 = arith.constant 0 : i32
    %c0_i32_2 = arith.constant 0 : i32
    return %arg0, %c0_i32, %c0_i32_0, %c0_i32_1 : i32, i32, i32, i32
  }
  func.func @transform_1(%arg0: i32) -> (i32, i32) {
    %c0_i32 = arith.constant 0 : i32
    %c0_i32_0 = arith.constant 0 : i32
    %c0_i32_1 = arith.constant 0 : i32
    return %c0_i32, %c0_i32_0 : i32, i32
  }
  func.func @transform_2(%arg0: i32) -> (i32, i32) {
    %c0_i32 = arith.constant 0 : i32
    %c0_i32_0 = arith.constant 0 : i32
    %c0_i32_1 = arith.constant 0 : i32
    return %c0_i32, %c0_i32_0 : i32, i32
  }
  func.func @transform_3(%arg0: i32) -> (i32, i32) {
    %c0_i32 = arith.constant 0 : i32
    %c0_i32_0 = arith.constant 0 : i32
    %c0_i32_1 = arith.constant 0 : i32
    return %c0_i32, %c0_i32_0 : i32, i32
  }
  func.func @transform_4(%arg0: i32) -> (i32, i32, i32) {
    %c0_i32 = arith.constant 0 : i32
    %c0_i32_0 = arith.constant 0 : i32
    %c0_i32_1 = arith.constant 0 : i32
    %c0_i32_2 = arith.constant 0 : i32
    return %c0_i32, %c0_i32_0, %c0_i32_1 : i32, i32, i32
  }
  func.func @transform_5(%arg0: i32) -> (i32, i32) {
    %c0_i32 = arith.constant 0 : i32
    %c0_i32_0 = arith.constant 0 : i32
    %c0_i32_1 = arith.constant 0 : i32
    return %c0_i32, %c0_i32_0 : i32, i32
  }
  func.func @transform_6(%arg0: i32) -> (i32, i32) {
    %c0_i32 = arith.constant 0 : i32
    %c0_i32_0 = arith.constant 0 : i32
    %c0_i32_1 = arith.constant 0 : i32
    return %c0_i32, %c0_i32_0 : i32, i32
  }
  func.func @transform_7(%arg0: i32) -> (i32, i32) {
    %c0_i32 = arith.constant 0 : i32
    %c0_i32_0 = arith.constant 0 : i32
    %c0_i32_1 = arith.constant 0 : i32
    return %c0_i32, %c0_i32_0 : i32, i32
  }
  func.func @transform_8(%arg0: i32) -> (i32, i32) {
    %c0_i32 = arith.constant 0 : i32
    %c0_i32_0 = arith.constant 0 : i32
    %c0_i32_1 = arith.constant 0 : i32
    return %c0_i32, %c0_i32_0 : i32, i32
  }
  func.func @transform_9(%arg0: i32) -> (i32, i32) {
    %c0_i32 = arith.constant 0 : i32
    %c0_i32_0 = arith.constant 0 : i32
    %c0_i32_1 = arith.constant 0 : i32
    return %c0_i32, %c0_i32_0 : i32, i32
  }
  func.func @transform_10(%arg0: i32) -> (i32, i32, i32, i32) {
    %c0_i32 = arith.constant 0 : i32
    %c0_i32_0 = arith.constant 0 : i32
    %c0_i32_1 = arith.constant 0 : i32
    %c0_i32_2 = arith.constant 0 : i32
    return %arg0, %c0_i32, %c0_i32_0, %c0_i32_1 : i32, i32, i32, i32
  }
}

</mosaic_0001>

<bundles_post_ra>
// kernel: tpu_custom_call.1
= control target key start
LH: loop header
LB: loop body
LE: loop exit
PB: predicated region body
PF: predicated region fallthrough
CT: control target
= control target key end

     0   :  { %15 = vsyncpa [#allocation3], 0  ;;  %s5173_s0 = inlined_call_operand.vmem [shape: f32[2,16,16,128], index: 0, kind: input, shape index: {}]   ;;  %s5174_s1 = inlined_call_operand.vmem [shape: f32[128,32], index: 1, kind: input, shape index: {}]   ;;  %s5175_s2 = inlined_call_operand.vmem [shape: f32[1,32], index: 2, kind: input, shape index: {}]   ;;  %s5176_s3 = inlined_call_operand.vmem [shape: f32[1,32], index: 3, kind: input, shape index: {}]   ;;  %s5177_s4 = inlined_call_operand.vmem [shape: f32[3,96,32], index: 4, kind: input, shape index: {}]   ;;  %s5178_s5 = inlined_call_operand.vmem [shape: f32[1,32], index: 5, kind: input, shape index: {}]   ;;  %s5179_s6 = inlined_call_operand.vmem [shape: f32[1,32], index: 6, kind: input, shape index: {}]   ;;  %s5180_s7 = inlined_call_operand.vmem [shape: f32[32,128], index: 7, kind: input, shape index: {}]   ;;  %s5181_s8 = inlined_call_operand.vmem [shape: f32[1,128], index: 8, kind: input, shape index: {}]   ;;  %s5182_s9 = inlined_call_operand.vmem [shape: f32[1,128], index: 9, kind: input, shape index: {}]   ;;  %s5183_s10 = inlined_call_operand.hbm [shape: f32[2,16,16,128], index: 10, kind: output, shape index: {}]  }
   0x1   :  { %17 = vsyncpa [#allocation3 + $0x1], 0  ;;  %s3880_s13 = smov 0   ;;  %s3882_s14 = smov 0  }
   0x2   :  { %s3884_s15 = smov 0   ;;  %s3886_s16 = smov 0  }
   0x3 LB: > { %s3901_s17 = sadd.s32 4294967295, %s3817_s16   ;;  %s2755_s18 = sadd.s32 4294967294, %s3817_s16   ;;  %s3817_s16 = sphi %s3886_s16, %s5199_s16   ;;  %s3813_s15 = sphi %s3884_s15, %s5198_s15   ;;  %s3809_s14 = sphi %s3882_s14, %s5197_s14   ;;  %s3805_s13 = sphi %s3880_s13, %s5196_s13  }
   0x4   : > { %s3905_s19 = sadd.s32 1, %s3817_s16   ;;  %s245_s20 = sadd.s32 1, %s3813_s15 }
   0x5   : > { %s242_s21 = ssub.s32 %s3817_s16, %s3905_s19  ;;  %p255_p0 = scmp.ne.s32.totalorder %s3813_s15, %s3809_s14 }
   0x6   : > { %p243_p1 = scmp.eq.s32.totalorder %s242_s21, 0  ;;  %p256_p2 = scmp.eq.s32.totalorder %s3901_s17, 1 }
   0x7   : > { %p261_p3 = scmp.ne.s32.totalorder %s3809_s14, %s3805_s13  ;;  %p262_p4 = scmp.eq.s32.totalorder %s2755_s18, 1 }
   0x8   : > { %s3916_s22 = scalar_select %p243_p1, %s3813_s15, %s245_s20  }
   0x9   : > { %p3918_p5 = por %p256_p2, %p255_p0  ;;  %p3922_p6 = por %p262_p4, %p261_p3 }
   0xa   : > { %p2758_p7 = scmp.ge.s32.totalorder %s3817_s16, 1  ;;  %p315_p8 = scmp.lt.s32.totalorder %s3817_s16, 3 }
   0xc   : > { %p316_p9 = pnand %p2758_p7, %p315_p8 }
   0xd   : > { %v390_v0 = vld [vmem:[%s5174_s1] sm:$0xff] (!%p316_p9)  ;;  %v391_v1 = vld [vmem:[%s5174_s1 + $0x8] sm:$0xff] (!%p316_p9)  ;;  %v392_v2 = vld [vmem:[%s5174_s1 + $0x10] sm:$0xff] (!%p316_p9)  ;;  %p353_p10 = scmp.lt.s32.totalorder (!%p316_p9), %s3901_s17, 1  ;;  %vm870_vm0 = vcmask (!%p316_p9), 1046528   ;;  %s3819_s28 = smov (!%p316_p9), 32  }
   0xe   : > { %319 = sbr.rel (%p316_p9) target bundleno = 1067 (0x42b), region = 60  ;;  %v3491_v3 = vpack.c.bf16 (!%p316_p9), %v391_v1, %v390_v0  ;;  %v393_v4 = vld [vmem:[%s5174_s1 + $0x18] sm:$0xff] (!%p316_p9)  ;;  %v394_v6 = vld [vmem:[%s5174_s1 + $0x20] sm:$0xff] (!%p316_p9)  ;;  %v395_v7 = vld [vmem:[%s5174_s1 + $0x28] sm:$0xff] (!%p316_p9)  ;;  %vm773_vm1 = vcmask (!%p316_p9), 1040384   ;;  %s3820_s29 = smov (!%p316_p9), 64  }
   0xf   : > { %v3495_v5 = vpack.c.bf16 (!%p316_p9), %v393_v4, %v392_v2  ;;  %v3499_v8 = vpack.c.bf16 (!%p316_p9), %v395_v7, %v394_v6  ;;  %v396_v9 = vld [vmem:[%s5174_s1 + $0x30] sm:$0xff] (!%p316_p9)  ;;  %v397_v10 = vld [vmem:[%s5174_s1 + $0x38] sm:$0xff] (!%p316_p9)  ;;  %v398_v13 = vld [vmem:[%s5174_s1 + $0x40] sm:$0xff] (!%p316_p9)  ;;  %vm1159_vm2 = vcmask (!%p316_p9), 261120   ;;  %vm1192_vm3 = vcmask (!%p316_p9), 523264   ;;  %s350_s18 = sand.u32 (!%p316_p9), 1, %s3809_s14  }
  0x10   : > { %3492 = vmatprep.subr.bf16.mxu0 (!%p316_p9), %v3491_v3  ;;  %v3503_v12 = vpack.c.bf16 (!%p316_p9), %v397_v10, %v396_v9  ;;  %v399_v14 = vld [vmem:[%s5174_s1 + $0x48] sm:$0xff] (!%p316_p9)  ;;  %v400_v16 = vld [vmem:[%s5174_s1 + $0x50] sm:$0xff] (!%p316_p9)  ;;  %v401_v17 = vld [vmem:[%s5174_s1 + $0x58] sm:$0xff] (!%p316_p9)  ;;  %vm1250_vm4 = vcmask (!%p316_p9), 785408   ;;  %s2759_s25 = sshll.u32 (!%p316_p9), %s350_s18, 8 }
  0x11   : > { %3494 = vmatpush3.bf16.msra.mxu0 (!%p316_p9), %v3491_v3  ;;  %v3507_v15 = vpack.c.bf16 (!%p316_p9), %v399_v14, %v398_v13  ;;  %v3511_v18 = vpack.c.bf16 (!%p316_p9), %v401_v17, %v400_v16  ;;  %v402_v19 = vld [vmem:[%s5174_s1 + $0x60] sm:$0xff] (!%p316_p9)  ;;  %v403_v20 = vld [vmem:[%s5174_s1 + $0x68] sm:$0xff] (!%p316_p9)  ;;  %v404_v22 = vld [vmem:[%s5174_s1 + $0x70] sm:$0xff] (!%p316_p9) }
  0x12   : > { %3496 = vmatprep.subr.bf16.mxu0 (!%p316_p9), %v3495_v5  ;;  %v3515_v21 = vpack.c.bf16 (!%p316_p9), %v403_v20, %v402_v19  ;;  %v405_v23 = vld [vmem:[%s5174_s1 + $0x78] sm:$0xff] (!%p316_p9)  ;;  %v2764_v56 = vld [vmem:[%s5177_s4 + $0x60] sm:$0xff] (!%p316_p9)  ;;  %v2765_v57 = vld [vmem:[%s5177_s4 + $0x68] sm:$0xff] (!%p316_p9) }
  0x13   : > { %v3519_v24 = vpack.c.bf16 (!%p316_p9), %v405_v23, %v404_v22  ;;  %v3523_v58 = vpack.c.bf16 (!%p316_p9), %v2765_v57, %v2764_v56  ;;  %v2766_v59 = vld [vmem:[%s5177_s4 + $0x70] sm:$0xff] (!%p316_p9)  ;;  %v2767_v60 = vld [vmem:[%s5177_s4 + $0x78] sm:$0xff] (!%p316_p9)  ;;  %v2768_v62 = vld [vmem:[%s5177_s4 + $0x80] sm:$0xff] (!%p316_p9) }
  0x14   : > { %v3527_v61 = vpack.c.bf16 (!%p316_p9), %v2767_v60, %v2766_v59  ;;  %v2769_v63 = vld [vmem:[%s5177_s4 + $0x88] sm:$0xff] (!%p316_p9)  ;;  %v2770_v1 = vld [vmem:[%s5177_s4 + $0x90] sm:$0xff] (!%p316_p9)  ;;  %v2771_v2 = vld [vmem:[%s5177_s4 + $0x98] sm:$0xff] (!%p316_p9) }
  0x15   : > { %s354_s26 = scalar_select %p353_p10, %s3901_s17, 1  ;;  %3498 = vmatpush3.bf16.msra.mxu0 %v3495_v5  ;;  %3603 = vmatprep.subr.bf16.mxu1 %v3523_v58  ;;  %v3531_v0 = vpack.c.bf16 %v2769_v63, %v2768_v62  ;;  %v3535_v3 = vpack.c.bf16 %v2771_v2, %v2770_v1  ;;  %v2772_v4 = vld [vmem:[%s5177_s4 + $0xa0] sm:$0xff]  ;;  %v2773_v5 = vld [vmem:[%s5177_s4 + $0xa8] sm:$0xff]  ;;  %v2774_v7 = vld [vmem:[%s5177_s4 + $0xb0] sm:$0xff] }
  0x16   : > { %3500 = vmatprep.subr.bf16.mxu0 %v3499_v8  ;;  %3609 = vmatpush3.bf16.msra.mxu1 %v3523_v58  ;;  %v3539_v6 = vpack.c.bf16 %v2773_v5, %v2772_v4  ;;  %v4054_v10 = vld [vmem:[%s5175_s2] ss:$0 sm:$0xff] }
  0x17   : > { %s2921_s27 = sshll.u32 %s354_s26, 8  ;;  %3604 = vmatprep.subr.bf16.mxu1 %v3527_v61  ;;  %s5001_s26 = scalar_lea.vmem [#allocation2], %s2759_s25 }
  0x18   : > { %s3951_s30 = scalar_lea.vmem %s5173_s0, %s2921_s27  ;;  %s2922_s27 = sshll.u32 %s3901_s17, 12 }
  0x19   : > { %v358_v11 = vld [vmem:[%s3951_s30] sm:$0xff]  ;;  %3502 = vmatpush3.bf16.msra.mxu0 %v3499_v8  ;;  %v359_v25 = vld [vmem:[%s3951_s30 + $0x8] sm:$0xff]  ;;  %v360_v26 = vld [vmem:[%s3951_s30 + $0x10] sm:$0xff]  ;;  %s5124_s12 = scalar_lea.hbm %s5183_s10, %s2922_s27  ;;  %s5132_s17 = scalar_lea.sflag [#allocation3], %s350_s18 }
  0x1a   : > { %3171 = vmatprep.mubr.f32.mxu0 %v358_v11  ;;  %3504 = vmatprep.subr.bf16.mxu0 %v3503_v12  ;;  %v361_v27 = vld [vmem:[%s3951_s30 + $0x18] sm:$0xff]  ;;  %v362_v28 = vld [vmem:[%s3951_s30 + $0x20] sm:$0xff]  ;;  %v363_v29 = vld [vmem:[%s3951_s30 + $0x28] sm:$0xff] }
  0x1b   : > { %v364_v30 = vld [vmem:[%s3951_s30 + $0x30] sm:$0xff]  ;;  %v365_v31 = vld [vmem:[%s3951_s30 + $0x38] sm:$0xff]  ;;  %v366_v32 = vld [vmem:[%s3951_s30 + $0x40] sm:$0xff]  ;;  %3610 = vmatpush3.bf16.msra.mxu1 %v3527_v61 }
  0x1c   : > { %v367_v33 = vld [vmem:[%s3951_s30 + $0x48] sm:$0xff]  ;;  %v368_v34 = vld [vmem:[%s3951_s30 + $0x50] sm:$0xff]  ;;  %v369_v35 = vld [vmem:[%s3951_s30 + $0x58] sm:$0xff]  ;;  %3605 = vmatprep.subr.bf16.mxu1 %v3531_v0 }
  0x1d   : > { %3506 = vmatpush3.bf16.msra.mxu0 %v3503_v12  ;;  %v370_v36 = vld [vmem:[%s3951_s30 + $0x60] sm:$0xff]  ;;  %v371_v37 = vld [vmem:[%s3951_s30 + $0x68] sm:$0xff]  ;;  %v372_v38 = vld [vmem:[%s3951_s30 + $0x70] sm:$0xff] }
  0x1e   : > { %3508 = vmatprep.subr.bf16.mxu0 %v3507_v15  ;;  %v373_v39 = vld [vmem:[%s3951_s30 + $0x78] sm:$0xff]  ;;  %v374_v40 = vld [vmem:[%s3951_s30 + $0x80] sm:$0xff]  ;;  %v375_v41 = vld [vmem:[%s3951_s30 + $0x88] sm:$0xff] }
  0x1f   : > { %v376_v42 = vld [vmem:[%s3951_s30 + $0x90] sm:$0xff]  ;;  %v377_v43 = vld [vmem:[%s3951_s30 + $0x98] sm:$0xff]  ;;  %v378_v44 = vld [vmem:[%s3951_s30 + $0xa0] sm:$0xff]  ;;  %3611 = vmatpush3.bf16.msra.mxu1 %v3531_v0 }
  0x20   : > { %v379_v45 = vld [vmem:[%s3951_s30 + $0xa8] sm:$0xff]  ;;  %v380_v46 = vld [vmem:[%s3951_s30 + $0xb0] sm:$0xff]  ;;  %v381_v47 = vld [vmem:[%s3951_s30 + $0xb8] sm:$0xff]  ;;  %3606 = vmatprep.subr.bf16.mxu1 %v3535_v3 }
  0x21   : > { %3510 = vmatpush3.bf16.msra.mxu0 %v3507_v15  ;;  %v382_v48 = vld [vmem:[%s3951_s30 + $0xc0] sm:$0xff]  ;;  %v383_v49 = vld [vmem:[%s3951_s30 + $0xc8] sm:$0xff]  ;;  %v384_v50 = vld [vmem:[%s3951_s30 + $0xd0] sm:$0xff] }
  0x22   : > { %3512 = vmatprep.subr.bf16.mxu0 %v3511_v18  ;;  %v385_v51 = vld [vmem:[%s3951_s30 + $0xd8] sm:$0xff]  ;;  %v386_v52 = vld [vmem:[%s3951_s30 + $0xe0] sm:$0xff]  ;;  %v387_v53 = vld [vmem:[%s3951_s30 + $0xe8] sm:$0xff] }
  0x23   : > { %v388_v54 = vld [vmem:[%s3951_s30 + $0xf0] sm:$0xff]  ;;  %v389_v55 = vld [vmem:[%s3951_s30 + $0xf8] sm:$0xff]  ;;  %3612 = vmatpush3.bf16.msra.mxu1 %v3535_v3  ;;  %v4059_v12 = vld [vmem:[%s5176_s3] ss:$0 sm:$0xff] }
  0x24   : > { %3607 = vmatprep.subr.bf16.mxu1 %v3539_v6  ;;  %v2775_v8 = vld [vmem:[%s5177_s4 + $0xb8] sm:$0xff] }
  0x25   : > { %3514 = vmatpush3.bf16.msra.mxu0 %v3511_v18  ;;  %v3543_v9 = vpack.c.bf16 %v2775_v8, %v2774_v7 }
  0x26   : > { %3516 = vmatprep.subr.bf16.mxu0 %v3515_v21 }
  0x27   : > { %3613 = vmatpush3.bf16.msra.mxu1 %v3539_v6 }
  0x28   : > { %3608 = vmatprep.subr.bf16.mxu1 %v3543_v9 }
  0x29   : > { %3518 = vmatpush3.bf16.msra.mxu0 %v3515_v21 }
  0x2a   : > { %3520 = vmatprep.subr.bf16.mxu0 %v3519_v24 }
  0x2b   : > { %3614 = vmatpush3.bf16.msra.mxu1 %v3543_v9 }
  0x2d   : > { %3522 = vmatpush3.bf16.msra.mxu0 %v3519_v24 }
  0x2e   : > { %3524 = vmatprep.subr.bf16.mxu0 %v3523_v58 }
  0x30   : > { %3172 = vmatmul.mubr.f32.vlgmr.msra.gmra.mrb[0].mxu0 %v359_v25 }
  0x31   : > { %3174 = vmatprep.mubr.f32.mxu0 %v360_v26  ;;  %3526 = vmatpush3.bf16.msra.mxu0 %v3523_v58 }
  0x32   : > { %3528 = vmatprep.subr.bf16.mxu0 %v3527_v61 }
  0x34   : > { %3175 = vmatmul.mubr.f32.gmra.mrb[2].mxu0 %v361_v27 }
  0x35   : > { %3177 = vmatprep.mubr.f32.mxu0 %v362_v28  ;;  %3530 = vmatpush3.bf16.msra.mxu0 %v3527_v61 }
  0x36   : > { %3532 = vmatprep.subr.bf16.mxu0 %v3531_v0 }
  0x38   : > { %3178 = vmatmul.mubr.f32.gmra.mrb[4].mxu0 %v363_v29 }
  0x39   : > { %3180 = vmatprep.mubr.f32.mxu0 %v364_v30  ;;  %3534 = vmatpush3.bf16.msra.mxu0 %v3531_v0 }
  0x3a   : > { %3536 = vmatprep.subr.bf16.mxu0 %v3535_v3 }
  0x3c   : > { %3181 = vmatmul.mubr.f32.gmra.mrb[6].mxu0 %v365_v31 }
  0x3d   : > { %3183 = vmatprep.mubr.f32.mxu0 %v366_v32  ;;  %3538 = vmatpush3.bf16.msra.mxu0 %v3535_v3 }
  0x3e   : > { %3540 = vmatprep.subr.bf16.mxu0 %v3539_v6 }
  0x40   : > { %3184 = vmatmul.mubr.f32.gmra.mrb[8].mxu0 %v367_v33 }
  0x41   : > { %3186 = vmatprep.mubr.f32.mxu0 %v368_v34  ;;  %3542 = vmatpush3.bf16.msra.mxu0 %v3539_v6 }
  0x42   : > { %3544 = vmatprep.subr.bf16.mxu0 %v3543_v9 }
  0x44   : > { %3187 = vmatmul.mubr.f32.gmra.mrb[10].mxu0 %v369_v35 }
  0x45   : > { %3189 = vmatprep.mubr.f32.mxu0 %v370_v36  ;;  %3546 = vmatpush3.bf16.msra.mxu0 %v3543_v9 }
  0x48   : > { %3190 = vmatmul.mubr.f32.gmra.mrb[12].mxu0 %v371_v37 }
  0x49   : > { %3192 = vmatprep.mubr.f32.mxu0 %v372_v38 }
  0x4c   : > { %3193 = vmatmul.mubr.f32.gmra.mrb[14].mxu0 %v373_v39 }
  0x4d   : > { %3195 = vmatprep.mubr.f32.mxu0 %v374_v40 }
  0x50   : > { %3196 = vmatmul.mubr.f32.gmra.mrb[16].mxu0 %v375_v41 }
  0x51   : > { %3198 = vmatprep.mubr.f32.mxu0 %v376_v42 }
  0x54   : > { %3199 = vmatmul.mubr.f32.gmra.mrb[18].mxu0 %v377_v43 }
  0x55   : > { %3201 = vmatprep.mubr.f32.mxu0 %v378_v44 }
  0x58   : > { %3202 = vmatmul.mubr.f32.gmra.mrb[20].mxu0 %v379_v45 }
  0x59   : > { %3204 = vmatprep.mubr.f32.mxu0 %v380_v46 }
  0x5c   : > { %3205 = vmatmul.mubr.f32.gmra.mrb[22].mxu0 %v381_v47 }
  0x5d   : > { %3207 = vmatprep.mubr.f32.mxu0 %v382_v48 }
  0x60   : > { %3208 = vmatmul.mubr.f32.gmra.mrb[24].mxu0 %v383_v49 }
  0x61   : > { %3210 = vmatprep.mubr.f32.mxu0 %v384_v50 }
  0x64   : > { %3211 = vmatmul.mubr.f32.gmra.mrb[26].mxu0 %v385_v51 }
  0x65   : > { %3213 = vmatprep.mubr.f32.mxu0 %v386_v52 }
  0x68   : > { %3214 = vmatmul.mubr.f32.gmra.mrb[28].mxu0 %v387_v53 }
  0x69   : > { %3216 = vmatprep.mubr.f32.mxu0 %v388_v54 }
  0x6c   : > { %3217 = vmatmul.mubr.f32.gmra.mrb[30].mxu0 %v389_v55 }
 0x103   : > { %v3173_v11 = vpop.f32.mrb[0].mxu0 }
 0x104   : > { %v639_v13 = vmul.f32 %v3173_v11, %v4054_v10  ;;  %v472_v14 = vpop.f32.mrb[1].mxu0 }
 0x105   : > { %v638_v15 = vmul.f32 %v4054_v10, %v472_v14 }
 0x106   : > { %v678_v16 = vadd.f32 %v4059_v12, %v639_v13 }
 0x107   : > { %v677_v17 = vadd.f32 %v4059_v12, %v638_v15  ;;  %v3176_v18 = vpop.f32.mrb[2].mxu0 }
 0x108   : > { %v710_v19 = vmax.f32 %v678_v16, 0.0  ;;  %v641_v20 = vmul.f32 %v3176_v18, %v4054_v10  ;;  %v482_v21 = vpop.f32.mrb[3].mxu0 }
 0x109   : > { %v4066_v22 = vmax.f32 %v677_v17, 0.0  ;;  %v640_v23 = vmul.f32 %v4054_v10, %v482_v21 }
 0x10a   : > { %v775_v24 = vrot.slane %v710_v19, 7  ;;  %v680_v25 = vadd.f32 %v4059_v12, %v641_v20  ;;  %953 = vrot.lane.b32.xlu1 %v710_v19, %s3819_s28  ;;  %v872_v26 = vrot.slane %v710_v19, 1 }
 0x10b   : > { %v774_v27 = vrot.slane %v4066_v22, 7  ;;  %v679_v28 = vadd.f32 %v4059_v12, %v640_v23  ;;  %951 = vrot.lane.b32.xlu0 %v4066_v22, %s3819_s28  ;;  %v3179_v29 = vpop.f32.mrb[4].mxu0  ;;  %v871_v30 = vrot.slane %v4066_v22, 1 }
 0x10c   : > { %v712_v31 = vmax.f32 %v680_v25, 0.0  ;;  %v643_v32 = vmul.f32 %v3179_v29, %v4054_v10  ;;  %v492_v33 = vpop.f32.mrb[5].mxu0  ;;  %v935_v34 = vsel %vm870_vm0, %v872_v26, 0.0 }
 0x10d   : > { %v4078_v35 = vmax.f32 %v679_v28, 0.0  ;;  %v642_v36 = vmul.f32 %v4054_v10, %v492_v33  ;;  %v873_v37 = vsel %vm870_vm0, %v871_v30, %v872_v26  ;;  %v4085_v38 = vsel %vm773_vm1, %v774_v27, %v775_v24 }
 0x10e   : > { %v778_v39 = vrot.slane %v712_v31, 7  ;;  %v682_v40 = vadd.f32 %v4059_v12, %v643_v32  ;;  %1065 = vrot.lane.b32.xlu1 %v935_v34, %s3820_s29  ;;  %v875_v41 = vrot.slane %v712_v31, 1 }
 0x10f   : > { %v777_v42 = vrot.slane %v4078_v35, 7  ;;  %v681_v43 = vadd.f32 %v4059_v12, %v642_v36  ;;  %1063 = vrot.lane.b32.xlu0 %v873_v37, %s3820_s29  ;;  %v3182_v44 = vpop.f32.mrb[6].mxu0  ;;  %v874_v45 = vrot.slane %v4078_v35, 1 }
 0x110   : > { %v714_v46 = vmax.f32 %v682_v40, 0.0  ;;  %v645_v47 = vmul.f32 %v3182_v44, %v4054_v10  ;;  %v502_v48 = vpop.f32.mrb[7].mxu0  ;;  %v936_v63 = vsel %vm870_vm0, %v875_v41, 0.0 }
 0x111   : > { %v4094_v49 = vmax.f32 %v681_v43, 0.0  ;;  %v644_v50 = vmul.f32 %v4054_v10, %v502_v48  ;;  %v876_v51 = vsel %vm870_vm0, %v874_v45, %v875_v41  ;;  %v4101_v52 = vsel %vm773_vm1, %v777_v42, %v778_v39 }
 0x112   : > { %v781_v53 = vrot.slane %v714_v46, 7  ;;  %v4104_v54 = vadd.f32 %v4059_v12, %v645_v47  ;;  %957 = vrot.lane.b32.xlu1 %v712_v31, %s3819_s28  ;;  %v878_v55 = vrot.slane %v714_v46, 1 }
 0x113   : > { %v780_v56 = vrot.slane %v4094_v49, 7  ;;  %v4109_v57 = vadd.f32 %v4059_v12, %v644_v50  ;;  %955 = vrot.lane.b32.xlu0 %v4078_v35, %s3819_s28  ;;  %v3185_v58 = vpop.f32.mrb[8].mxu0  ;;  %v877_v59 = vrot.slane %v4094_v49, 1 }
 0x114   : > { %v647_v60 = vmul.f32 %v3185_v58, %v4054_v10  ;;  %v512_v61 = vpop.f32.mrb[9].mxu0  ;;  %v937_v16 = vsel %vm870_vm0, %v878_v55, 0.0 }
 0x115   : > { %v646_v62 = vmul.f32 %v4054_v10, %v512_v61  ;;  %v879_v0 = vsel %vm870_vm0, %v877_v59, %v878_v55  ;;  %v4121_v1 = vsel %vm773_vm1, %v780_v56, %v781_v53 }
 0x116   : > { %v4124_v2 = vadd.f32 %v4059_v12, %v647_v60  ;;  %1069 = vrot.lane.b32.xlu1 %v936_v63, %s3820_s29 }
 0x117   : > { %v4128_v3 = vadd.f32 %v4059_v12, %v646_v62  ;;  %1067 = vrot.lane.b32.xlu0 %v876_v51, %s3820_s29  ;;  %v3188_v4 = vpop.f32.mrb[10].mxu0 }
 0x118   : > { %v649_v5 = vmul.f32 %v3188_v4, %v4054_v10  ;;  %v522_v6 = vpop.f32.mrb[11].mxu0 }
 0x119   : > { %v648_v7 = vmul.f32 %v4054_v10, %v522_v6 }
 0x11a   : > { %v4134_v8 = vadd.f32 %v4059_v12, %v649_v5  ;;  %961 = vrot.lane.b32.xlu1 %v714_v46, %s3819_s28 }
 0x11b   : > { %v4138_v9 = vadd.f32 %v4059_v12, %v648_v7  ;;  %959 = vrot.lane.b32.xlu0 %v4094_v49, %s3819_s28  ;;  %v3191_v11 = vpop.f32.mrb[12].mxu0 }
 0x11c   : > { %v651_v13 = vmul.f32 %v3191_v11, %v4054_v10  ;;  %v532_v14 = vpop.f32.mrb[13].mxu0 }
 0x11d   : > { %v650_v15 = vmul.f32 %v4054_v10, %v532_v14 }
 0x11e   : > { %v4146_v17 = vadd.f32 %v4059_v12, %v651_v13  ;;  %1073 = vrot.lane.b32.xlu1 %v937_v16, %s3820_s29 }
 0x11f   : > { %v4150_v18 = vadd.f32 %v4059_v12, %v650_v15  ;;  %1071 = vrot.lane.b32.xlu0 %v879_v0, %s3820_s29  ;;  %v3194_v19 = vpop.f32.mrb[14].mxu0 }
 0x120   : > { %v653_v20 = vmul.f32 %v3194_v19, %v4054_v10  ;;  %v542_v21 = vpop.f32.mrb[15].mxu0 }
 0x121   : > { %v652_v23 = vmul.f32 %v4054_v10, %v542_v21 }
 0x122   : > { %v692_v24 = vadd.f32 %v4059_v12, %v653_v20 }
 0x123   : > { %v691_v25 = vadd.f32 %v4059_v12, %v652_v23  ;;  %v3197_v26 = vpop.f32.mrb[16].mxu0 }
 0x124   : > { %v724_v28 = vmax.f32 %v692_v24, 0.0  ;;  %v655_v29 = vmul.f32 %v3197_v26, %v4054_v10  ;;  %v552_v30 = vpop.f32.mrb[17].mxu0 }
 0x125   : > { %v4158_v31 = vmax.f32 %v691_v25, 0.0  ;;  %v654_v32 = vmul.f32 %v4054_v10, %v552_v30 }
 0x126   : > { %v796_v33 = vrot.slane %v724_v28, 7  ;;  %981 = vrot.lane.b32.xlu0 %v724_v28, %s3819_s28  ;;  %v694_v34 = vadd.f32 %v4059_v12, %v655_v29  ;;  %v893_v36 = vrot.slane %v724_v28, 1 }
 0x127   : > { %v5188_v37 = vrot.slane %v4158_v31, 7  ;;  %v693_v39 = vadd.f32 %v4059_v12, %v654_v32  ;;  %v892_v40 = vrot.slane %v4158_v31, 1  ;;  %v3200_v41 = vpop.f32.mrb[18].mxu0 }
 0x128   : > { %v726_v43 = vmax.f32 %v694_v34, 0.0  ;;  %v942_v44 = vsel %vm870_vm0, %v893_v36, 0.0  ;;  %v657_v45 = vmul.f32 %v3200_v41, %v4054_v10  ;;  %v562_v46 = vpop.f32.mrb[19].mxu0 }
 0x129   : > { %v4168_v47 = vmax.f32 %v693_v39, 0.0  ;;  %1093 = vrot.lane.b32.xlu1 %v942_v44, %s3820_s29  ;;  %v894_v48 = vsel %vm870_vm0, %v892_v40, %v893_v36  ;;  %v656_v50 = vmul.f32 %v4054_v10, %v562_v46  ;;  %v4176_v51 = vsel %vm773_vm1, %v5188_v37, %v796_v33 }
 0x12a   : > { %v799_v53 = vrot.slane %v726_v43, 7  ;;  %979 = vrot.lane.b32.xlu0 %v4158_v31, %s3819_s28  ;;  %v696_v55 = vadd.f32 %v4059_v12, %v657_v45  ;;  %v896_v58 = vrot.slane %v726_v43, 1 }
 0x12b   : > { %v695_v59 = vadd.f32 %v4059_v12, %v656_v50  ;;  %v895_v60 = vrot.slane %v4168_v47, 1  ;;  %v3203_v61 = vpop.f32.mrb[20].mxu0  ;;  %v5187_v62 = vrot.slane %v4168_v47, 7 }
 0x12c   : > { %v4184_v63 = vmax.f32 %v696_v55, 0.0  ;;  %v659_v0 = vmul.f32 %v3203_v61, %v4054_v10  ;;  %v572_v4 = vpop.f32.mrb[21].mxu0 }
 0x12d   : > { %1091 = vrot.lane.b32.xlu1 %v894_v48, %s3820_s29  ;;  %v4188_v5 = vmax.f32 %v695_v59, 0.0  ;;  %v897_v6 = vsel %vm870_vm0, %v895_v60, %v896_v58  ;;  %v658_v7 = vmul.f32 %v4054_v10, %v572_v4  ;;  %v4200_v15 = vsel %vm773_vm1, %v5187_v62, %v799_v53 }
 0x12e   : > { %983 = vrot.lane.b32.xlu0 %v4168_v47, %s3819_s28  ;;  %v802_v11 = vrot.slane %v4184_v63, 7  ;;  %v698_v13 = vadd.f32 %v4059_v12, %v659_v0  ;;  %v899_v14 = vrot.slane %v4184_v63, 1 }
 0x12f   : > { %v697_v16 = vadd.f32 %v4059_v12, %v658_v7  ;;  %v898_v19 = vrot.slane %v4188_v5, 1  ;;  %v3206_v20 = vpop.f32.mrb[22].mxu0  ;;  %v5186_v21 = vrot.slane %v4188_v5, 7 }
 0x130   : > { %v4205_v23 = vmax.f32 %v698_v13, 0.0  ;;  %v661_v24 = vmul.f32 %v3206_v20, %v4054_v10  ;;  %v582_v25 = vpop.f32.mrb[23].mxu0 }
 0x131   : > { %985 = vrot.lane.b32.xlu1 %v726_v43, %s3819_s28  ;;  %v4209_v26 = vmax.f32 %v697_v16, 0.0  ;;  %v900_v28 = vsel %vm870_vm0, %v898_v19, %v899_v14  ;;  %v660_v29 = vmul.f32 %v4054_v10, %v582_v25  ;;  %v4220_v34 = vsel %vm773_vm1, %v5186_v21, %v802_v11 }
 0x132   : > { %1095 = vrot.lane.b32.xlu0 %v897_v6, %s3820_s29  ;;  %v805_v30 = vrot.slane %v4205_v23, 7  ;;  %v700_v32 = vadd.f32 %v4059_v12, %v661_v24  ;;  %v902_v33 = vrot.slane %v4205_v23, 1  ;;  %v943_v43 = vsel %vm870_vm0, %v896_v58, 0.0 }
 0x133   : > { %v699_v36 = vadd.f32 %v4059_v12, %v660_v29  ;;  %v901_v39 = vrot.slane %v4209_v26, 1  ;;  %v3209_v40 = vpop.f32.mrb[24].mxu0  ;;  %v5185_v41 = vrot.slane %v4209_v26, 7 }
 0x134   : > { %v4226_v44 = vmax.f32 %v700_v32, 0.0  ;;  %v663_v45 = vmul.f32 %v3209_v40, %v4054_v10  ;;  %v592_v46 = vpop.f32.mrb[25].mxu0 }
 0x135   : > { %1097 = vrot.lane.b32.xlu1 %v943_v43, %s3820_s29  ;;  %v4230_v48 = vmax.f32 %v699_v36, 0.0  ;;  %v903_v50 = vsel %vm870_vm0, %v901_v39, %v902_v33  ;;  %v662_v53 = vmul.f32 %v4054_v10, %v592_v46  ;;  %v4244_v60 = vsel %vm773_vm1, %v5185_v41, %v805_v30 }
 0x136   : > { %987 = vrot.lane.b32.xlu0 %v4188_v5, %s3819_s28  ;;  %v808_v55 = vrot.slane %v4226_v44, 7  ;;  %v702_v58 = vadd.f32 %v4059_v12, %v663_v45  ;;  %v905_v59 = vrot.slane %v4226_v44, 1 }
 0x137   : > { %v701_v61 = vadd.f32 %v4059_v12, %v662_v53  ;;  %v904_v0 = vrot.slane %v4230_v48, 1  ;;  %v3212_v4 = vpop.f32.mrb[26].mxu0  ;;  %v5184_v6 = vrot.slane %v4230_v48, 7 }
 0x138   : > { %v4249_v7 = vmax.f32 %v702_v58, 0.0  ;;  %v665_v11 = vmul.f32 %v3212_v4, %v4054_v10  ;;  %v602_v13 = vpop.f32.mrb[27].mxu0 }
 0x139   : > { %989 = vrot.lane.b32.xlu1 %v4184_v63, %s3819_s28  ;;  %v4254_v16 = vmax.f32 %v701_v61, 0.0  ;;  %v4259_v19 = vsel %vm870_vm0, %v904_v0, %v905_v59  ;;  %v664_v20 = vmul.f32 %v4054_v10, %v602_v13  ;;  %v4269_v63 = vsel %vm773_vm1, %v5184_v6, %v808_v55 }
 0x13a   : > { %1099 = vrot.lane.b32.xlu0 %v900_v28, %s3820_s29  ;;  %v811_v24 = vrot.slane %v4249_v7, 7  ;;  %v704_v25 = vadd.f32 %v4059_v12, %v665_v11  ;;  %v908_v29 = vrot.slane %v4249_v7, 1  ;;  %v944_v28 = vsel %vm870_vm0, %v899_v14, 0.0 }
 0x13b   : > { %v703_v30 = vadd.f32 %v4059_v12, %v664_v20  ;;  %v907_v32 = vrot.slane %v4254_v16, 1  ;;  %v3215_v36 = vpop.f32.mrb[28].mxu0  ;;  %v810_v39 = vrot.slane %v4254_v16, 7 }
 0x13c   : > { %v4275_v40 = vmax.f32 %v704_v25, 0.0  ;;  %v947_v43 = vsel %vm870_vm0, %v908_v29, 0.0  ;;  %v667_v45 = vmul.f32 %v3215_v36, %v4054_v10  ;;  %v612_v46 = vpop.f32.mrb[29].mxu0 }
 0x13d   : > { %1101 = vrot.lane.b32.xlu1 %v944_v28, %s3820_s29  ;;  %v735_v53 = vmax.f32 %v703_v30, 0.0  ;;  %v909_v55 = vsel %vm870_vm0, %v907_v32, %v908_v29  ;;  %v666_v58 = vmul.f32 %v4054_v10, %v612_v46  ;;  %v4283_v61 = vsel %vm773_vm1, 0.0, %v810_v39 }
 0x13e   : > { %991 = vrot.lane.b32.xlu0 %v4209_v26, %s3819_s28  ;;  %v706_v14 = vadd.f32 %v4059_v12, %v667_v45  ;;  %v911_v0 = vrot.slane %v4275_v40, 1  ;;  %v4290_v4 = vsel %vm773_vm1, %v810_v39, %v811_v24  ;;  %v814_v11 = vrot.slane %v4275_v40, 7  ;;  %v1225_v45 = vld [vmem:[%s5177_s4] sm:$0xff]  ;;  %v1226_v24 = vld [vmem:[%s5177_s4 + $0x8] sm:$0xff] }
 0x13f   : > { %v705_v13 = vadd.f32 %v4059_v12, %v666_v58  ;;  %v910_v20 = vrot.slane %v735_v53, 1  ;;  %v3218_v25 = vpop.f32.mrb[30].mxu0  ;;  %v813_v29 = vrot.slane %v735_v53, 7 }
 0x140   : > { %v738_v30 = vmax.f32 %v706_v14, 0.0  ;;  %v948_v32 = vsel %vm870_vm0, %v911_v0, 0.0  ;;  %v669_v36 = vmul.f32 %v3218_v25, %v4054_v10  ;;  %v622_v28 = vpop.f32.mrb[31].mxu0  ;;  %v4306_v14 = vpack.c.bf16 %v1226_v24, %v1225_v45 }
 0x141   : > { %993 = vrot.lane.b32.xlu1 %v4205_v23, %s3819_s28  ;;  %v737_v39 = vmax.f32 %v705_v13, 0.0  ;;  %v912_v46 = vsel %vm870_vm0, %v910_v20, %v911_v0  ;;  %v668_v58 = vmul.f32 %v4054_v10, %v622_v28  ;;  %v4311_v21 = vsel %vm773_vm1, 0.0, %v813_v29 }
 0x142   : > { %1103 = vrot.lane.b32.xlu0 %v903_v50, %s3820_s29  ;;  %v817_v25 = vrot.slane %v738_v30, 7  ;;  %v708_v6 = vadd.f32 %v4059_v12, %v669_v36  ;;  %v914_v41 = vrot.slane %v738_v30, 1  ;;  %3548 = vmatprep.subr.bf16.mxu1 %v4306_v14  ;;  %v4316_v0 = vsel %vm773_vm1, %v813_v29, %v814_v11 }
 0x143   : > { %v707_v62 = vadd.f32 %v4059_v12, %v668_v58  ;;  %v913_v37 = vrot.slane %v737_v39, 1  ;;  %v816_v10 = vrot.slane %v737_v39, 7  ;;  %v945_v50 = vsel %vm870_vm0, %v902_v33, 0.0 }
 0x144   : > { %v740_v13 = vmax.f32 %v708_v6, 0.0  ;;  %v949_v20 = vsel %vm870_vm0, %v914_v41, 0.0  ;;  %v946_v24 = vsel %vm870_vm0, %v905_v59, 0.0  ;;  %v4368_v59 = vmax.f32 %v4109_v57, 0.0 }
 0x145   : > { %1105 = vrot.lane.b32.xlu1 %v945_v50, %s3820_s29  ;;  %v739_v36 = vmax.f32 %v707_v62, 0.0  ;;  %v915_v28 = vsel %vm870_vm0, %v913_v37, %v914_v41  ;;  %v4325_v12 = vsel %vm773_vm1, 0.0, %v816_v10  ;;  %v4328_v45 = vsel %vm773_vm1, %v816_v10, %v817_v25 }
 0x146   : > { %995 = vrot.lane.b32.xlu0 %v4230_v48, %s3819_s28  ;;  %v820_v23 = vrot.slane %v740_v13, 7  ;;  %v917_v11 = vrot.slane %v740_v13, 1  ;;  %v4413_v25 = vmax.f32 %v4146_v17, 0.0  ;;  %v4416_v10 = vmax.f32 %v4150_v18, 0.0 }
 0x147   : > { %v916_v33 = vrot.slane %v739_v36, 1  ;;  %v819_v6 = vrot.slane %v739_v36, 7 }
 0x148   : > { %v950_v29 = vsel %vm870_vm0, %v917_v11, 0.0 }
 0x149   : > { %997 = vrot.lane.b32.xlu1 %v4226_v44, %s3819_s28  ;;  %v918_v37 = vsel %vm870_vm0, %v916_v33, %v917_v11  ;;  %v4337_v62 = vsel %vm773_vm1, 0.0, %v819_v6  ;;  %v4340_v41 = vsel %vm773_vm1, %v819_v6, %v820_v23  ;;  %v4365_v44 = vmax.f32 %v4104_v54, 0.0 }
 0x14a   : > { %1107 = vrot.lane.b32.xlu0 %v4259_v19, %s3820_s29  ;;  %v4378_v19 = vmax.f32 %v4124_v2, 0.0  ;;  %v4381_v54 = vmax.f32 %v4128_v3, 0.0  ;;  %v4394_v2 = vmax.f32 %v4134_v8, 0.0  ;;  %v4397_v3 = vmax.f32 %v4138_v9, 0.0 }
 0x14b   : > { %v854_v9 = vsel %vm773_vm1, 0.0, %v774_v27  ;;  %v890_v23 = vrot.slane %v4413_v25, 1  ;;  %v855_v11 = vsel %vm773_vm1, 0.0, %v777_v42 }
 0x14c   : > { %v887_v8 = vrot.slane %v4394_v2, 1 }
 0x14d   : > { %1109 = vrot.lane.b32.xlu1 %v946_v24, %s3820_s29 }
 0x14e   : > { %999 = vrot.lane.b32.xlu0 %v4254_v16, %s3819_s28  ;;  %v881_v16 = vrot.slane %v4365_v44, 1 }
 0x151   : > { %1001 = vrot.lane.b32.xlu1 %v4249_v7, %s3819_s28  ;;  %v880_v7 = vrot.slane %v4368_v59, 1 }
 0x152   : > { %1111 = vrot.lane.b32.xlu0 %v909_v55, %s3820_s29 }
 0x153   : > { %v882_v57 = vsel %vm870_vm0, %v880_v7, %v881_v16 }
 0x155   : > { %1113 = vrot.lane.b32.xlu1 %v947_v43, %s3820_s29  ;;  %v883_v43 = vrot.slane %v4381_v54, 1 }
 0x156   : > { %1003 = vrot.lane.b32.xlu0 %v735_v53, %s3819_s28  ;;  %v884_v53 = vrot.slane %v4378_v19, 1 }
 0x158   : > { %v885_v55 = vsel %vm870_vm0, %v883_v43, %v884_v53 }
 0x159   : > { %1005 = vrot.lane.b32.xlu1 %v4275_v40, %s3819_s28  ;;  %v938_v40 = vsel %vm870_vm0, %v881_v16, 0.0  ;;  %v941_v16 = vsel %vm870_vm0, %v890_v23, 0.0 }
 0x15a   : > { %1115 = vrot.lane.b32.xlu0 %v912_v46, %s3820_s29  ;;  %v886_v46 = vrot.slane %v4397_v3, 1 }
 0x15d   : > { %1117 = vrot.lane.b32.xlu1 %v948_v32, %s3820_s29  ;;  %v939_v32 = vsel %vm870_vm0, %v884_v53, 0.0 }
 0x15e   : > { %1007 = vrot.lane.b32.xlu0 %v737_v39, %s3819_s28 }
 0x161   : > { %1009 = vrot.lane.b32.xlu1 %v738_v30, %s3819_s28 }
 0x162   : > { %1119 = vrot.lane.b32.xlu0 %v915_v28, %s3820_s29 }
 0x165   : > { %1121 = vrot.lane.b32.xlu1 %v949_v20, %s3820_s29  ;;  %v888_v20 = vsel %vm870_vm0, %v886_v46, %v887_v8  ;;  %v1227_v46 = vld [vmem:[%s5177_s4 + $0x10] sm:$0xff] }
 0x166   : > { %1011 = vrot.lane.b32.xlu0 %v739_v36, %s3819_s28  ;;  %v940_v36 = vsel %vm870_vm0, %v887_v8, 0.0  ;;  %v5191_v8 = vrot.slane %v4158_v31, 7  ;;  %v1229_v31 = vld [vmem:[%s5177_s4 + $0x20] sm:$0xff] }
 0x169   : > { %1013 = vrot.lane.b32.xlu1 %v740_v13, %s3819_s28 }
 0x16a   : > { %1123 = vrot.lane.b32.xlu0 %v918_v37, %s3820_s29 }
 0x16d   : > { %1125 = vrot.lane.b32.xlu1 %v950_v29, %s3820_s29 }
 0x16e   : > { %963 = vrot.lane.b32.xlu0 %v4368_v59, %s3819_s28 }
 0x171   : > { %965 = vrot.lane.b32.xlu1 %v4365_v44, %s3819_s28 }
 0x172   : > { %1075 = vrot.lane.b32.xlu0 %v882_v57, %s3820_s29 }
 0x175   : > { %1077 = vrot.lane.b32.xlu1 %v938_v40, %s3820_s29 }
 0x176   : > { %967 = vrot.lane.b32.xlu0 %v4381_v54, %s3819_s28 }
 0x179   : > { %969 = vrot.lane.b32.xlu1 %v4378_v19, %s3819_s28 }
 0x17a   : > { %1079 = vrot.lane.b32.xlu0 %v885_v55, %s3820_s29 }
 0x17c   : > { %v954_v30 = vpop.permute.xlu1 %953 }
 0x17d   : > { %v952_v39 = vpop.permute.xlu0 %951  ;;  %1081 = vrot.lane.b32.xlu1 %v939_v32, %s3820_s29  ;;  %v1161_v22 = vsel %vm1159_vm2, %v4085_v38, %v954_v30  ;;  %v889_v38 = vrot.slane %v4416_v10, 1 }
 0x17e   : > { %971 = vrot.lane.b32.xlu0 %v4397_v3, %s3819_s28  ;;  %v1160_v50 = vsel %vm1159_vm2, %v854_v9, %v952_v39  ;;  %v861_v9 = vsel %vm773_vm1, 0.0, %v5191_v8 }
 0x17f   : > { %v891_v37 = vsel %vm870_vm0, %v889_v38, %v890_v23 }
 0x180   : > { %v1066_v58 = vpop.permute.xlu1 %1065 }
 0x181   : > { %v1064_v13 = vpop.permute.xlu0 %1063  ;;  %973 = vrot.lane.b32.xlu1 %v4394_v2, %s3819_s28  ;;  %v4429_v17 = vsel %vm1192_vm3, %v1161_v22, %v1066_v58 }
 0x182   : > { %v4425_v27 = vsel %vm1192_vm3, %v1160_v50, %v1064_v13  ;;  %1083 = vrot.lane.b32.xlu0 %v888_v20, %s3820_s29 }
 0x183   : > { %3243 = vmatprep.mubr.msk.f32.mxu0 %vm1250_vm4, %v4425_v27 }
 0x184   : > { %3244 = vmatmul.mubr.msk.f32.vlgmr.msra.gmra.mrb[32].mxu0 %vm1250_vm4, %v4429_v17  ;;  %v958_v18 = vpop.permute.xlu1 %957 }
 0x185   : > { %v956_v28 = vpop.permute.xlu0 %955  ;;  %1085 = vrot.lane.b32.xlu1 %v940_v36, %s3820_s29  ;;  %v1163_v24 = vsel %vm1159_vm2, %v4101_v52, %v958_v18  ;;  %v856_v52 = vsel %vm773_vm1, 0.0, %v780_v56 }
 0x186   : > { %975 = vrot.lane.b32.xlu0 %v4416_v10, %s3819_s28  ;;  %v1162_v6 = vsel %vm1159_vm2, %v855_v11, %v956_v28  ;;  %v1230_v28 = vld [vmem:[%s5177_s4 + $0x28] sm:$0xff] }
 0x188   : > { %v1070_v33 = vpop.permute.xlu1 %1069 }
 0x189   : > { %v1068_v29 = vpop.permute.xlu0 %1067  ;;  %977 = vrot.lane.b32.xlu1 %v4413_v25, %s3819_s28  ;;  %v4455_v35 = vsel %vm1192_vm3, %v1163_v24, %v1070_v33  ;;  %s2693_s28 = sshll.u32 %s5001_s26, 4  ;;  %s5126_s28 = int_to_ptr.vmem [resolvable:$true] %s2693_s28 }
 0x18a   : > { %v4451_v7 = vsel %vm1192_vm3, %v1162_v6, %v1068_v29  ;;  %1087 = vrot.lane.b32.xlu0 %v891_v37, %s3820_s29  ;;  %v3555_v6 = vpack.c.bf16 %v1230_v28, %v1229_v31  ;;  %v1231_v37 = vld [vmem:[%s5177_s4 + $0x30] sm:$0xff]  ;;  %s3755_s20 = scalar_lea.vmem %s5126_s28, 4096 }
 0x18b   : > { %3246 = vmatprep.mubr.msk.f32.mxu0 %vm1250_vm4, %v4451_v7  ;;  %p3756_p11 = scmp.ne.s32.totalorder %s5126_s28, %s3755_s20 }
 0x18c   : > { %3247 = vmatmul.mubr.msk.f32.gmra.mrb[34].mxu0 %vm1250_vm4, %v4455_v35  ;;  %v962_v42 = vpop.permute.xlu1 %961 }
 0x18d   : > { %v960_v57 = vpop.permute.xlu0 %959  ;;  %1089 = vrot.lane.b32.xlu1 %v941_v16, %s3820_s29  ;;  %v1165_v55 = vsel %vm1159_vm2, %v4121_v1, %v962_v42  ;;  %v1228_v1 = vld [vmem:[%s5177_s4 + $0x18] sm:$0xff]  ;;  %p3757_p12 = pnand %p3756_p11, %p3918_p5 }
 0x18e   : > { %v1164_v43 = vsel %vm1159_vm2, %v856_v52, %v960_v57  ;;  %v3551_v18 = vpack.c.bf16 %v1228_v1, %v1227_v46  ;;  %v1233_v52 = vld [vmem:[%s5177_s4 + $0x40] sm:$0xff]  ;;  %v1235_v46 = vld [vmem:[%s5177_s4 + $0x50] sm:$0xff] }
 0x18f   : > { %p3758_p13 = pneg %p3757_p12 }
 0x190   : > { %v1074_v40 = vpop.permute.xlu1 %1073 }
 0x191   : > { %v1072_v53 = vpop.permute.xlu0 %1071  ;;  %v4473_v32 = vsel %vm1192_vm3, %v1165_v55, %v1074_v40  ;;  %v1234_v40 = vld [vmem:[%s5177_s4 + $0x48] sm:$0xff] }
 0x192   : > { %v4470_v30 = vsel %vm1192_vm3, %v1164_v43, %v1072_v53 }
 0x193   : > { %3249 = vmatprep.mubr.msk.f32.mxu0 %vm1250_vm4, %v4470_v30 }
 0x194   : > { %3250 = vmatmul.mubr.msk.f32.gmra.mrb[36].mxu0 %vm1250_vm4, %v4473_v32 }
 0x198   : > { %v982_v49 = vpop.permute.xlu0 %981 }
 0x199   : > { %v1175_v13 = vsel %vm1159_vm2, %v4176_v51, %v982_v49  ;;  %v5192_v51 = vrot.slane %v4168_v47, 7  ;;  %v1232_v47 = vld [vmem:[%s5177_s4 + $0x38] sm:$0xff] }
 0x19a   : > { %v3559_v57 = vpack.c.bf16 %v1232_v47, %v1231_v37  ;;  %v5195_v37 = vrot.slane %v4230_v48, 7 }
 0x19b   : > { %v1094_v56 = vpop.permute.xlu1 %1093  ;;  %v862_v38 = vsel %vm773_vm1, 0.0, %v5192_v51 }
 0x19c   : > { %v980_v39 = vpop.permute.xlu0 %979  ;;  %v4495_v36 = vsel %vm1192_vm3, %v1175_v13, %v1094_v56  ;;  %v3563_v56 = vpack.c.bf16 %v1234_v40, %v1233_v52  ;;  %v2838_v13 = vld [vmem:[%s5177_s4 + $0xc0] sm:$0xff]  ;;  %v865_v47 = vsel %vm773_vm1, 0.0, %v5195_v37 }
 0x19d   : > { %v1174_v58 = vsel %vm1159_vm2, %v861_v9, %v980_v39 }
 0x19f   : > { %v1092_v50 = vpop.permute.xlu1 %1091 }
 0x1a0   : > { %v984_v20 = vpop.permute.xlu0 %983  ;;  %v4492_v22 = vsel %vm1192_vm3, %v1174_v58, %v1092_v50 }
 0x1a1   : > { %3264 = vmatprep.mubr.msk.f32.mxu1 %vm1250_vm4, %v4492_v22  ;;  %v1176_v11 = vsel %vm1159_vm2, %v862_v38, %v984_v20  ;;  %v2839_v20 = vld [vmem:[%s5177_s4 + $0xc8] sm:$0xff] }
 0x1a2   : > { %3265 = vmatmul.mubr.msk.f32.vlgmr.msra.gmra.mrb[0].mxu1 %vm1250_vm4, %v4495_v36  ;;  %v4568_v38 = vpack.c.bf16 %v2839_v20, %v2838_v13 }
 0x1a3   : > { %v986_v23 = vpop.permute.xlu1 %985  ;;  %3550 = vmatpush3.bf16.msra.mxu1 %v4306_v14 }
 0x1a4   : > { %v1096_v33 = vpop.permute.xlu0 %1095  ;;  %3552 = vmatprep.subr.bf16.mxu1 %v3551_v18  ;;  %v1177_v14 = vsel %vm1159_vm2, %v4200_v15, %v986_v23  ;;  %v5193_v15 = vrot.slane %v4188_v5, 7  ;;  %v1236_v5 = vld [vmem:[%s5177_s4 + $0x58] sm:$0xff] }
 0x1a5   : > { %v4513_v29 = vsel %vm1192_vm3, %v1176_v11, %v1096_v33  ;;  %v3567_v50 = vpack.c.bf16 %v1236_v5, %v1235_v46 }
 0x1a6   : > { %3267 = vmatprep.mubr.msk.f32.mxu1 %vm1250_vm4, %v4513_v29  ;;  %v863_v43 = vsel %vm773_vm1, 0.0, %v5193_v15 }
 0x1a7   : > { %v1098_v24 = vpop.permute.xlu1 %1097  ;;  %3554 = vmatpush3.bf16.msra.mxu1 %v3551_v18 }
 0x1a8   : > { %v4526_v42 = vsel %vm1192_vm3, %v1177_v14, %v1098_v24  ;;  %v988_v16 = vpop.permute.xlu0 %987  ;;  %3556 = vmatprep.subr.bf16.mxu1 %v3555_v6 }
 0x1a9   : > { %3268 = vmatmul.mubr.msk.f32.gmra.mrb[2].mxu1 %vm1250_vm4, %v4526_v42  ;;  %v1178_v55 = vsel %vm1159_vm2, %v863_v43, %v988_v16 }
 0x1ab   : > { %v990_v53 = vpop.permute.xlu1 %989  ;;  %3558 = vmatpush3.bf16.msra.mxu1 %v3555_v6 }
 0x1ac   : > { %v1100_v49 = vpop.permute.xlu0 %1099  ;;  %3560 = vmatprep.subr.bf16.mxu1 %v3559_v57  ;;  %v1179_v1 = vsel %vm1159_vm2, %v4220_v34, %v990_v53  ;;  %v5194_v34 = vrot.slane %v4209_v26, 7 }
 0x1ad   : > { %v4541_v39 = vsel %vm1192_vm3, %v1178_v55, %v1100_v49 }
 0x1ae   : > { %3270 = vmatprep.mubr.msk.f32.mxu1 %vm1250_vm4, %v4541_v39  ;;  %v864_v18 = vsel %vm773_vm1, 0.0, %v5194_v34 }
 0x1af   : > { %v1102_v8 = vpop.permute.xlu1 %1101  ;;  %3562 = vmatpush3.bf16.msra.mxu1 %v3559_v57 }
 0x1b0   : > { %v4554_v9 = vsel %vm1192_vm3, %v1179_v1, %v1102_v8  ;;  %v992_v58 = vpop.permute.xlu0 %991  ;;  %3564 = vmatprep.subr.bf16.mxu1 %v3563_v56 }
 0x1b1   : > { %3271 = vmatmul.mubr.msk.f32.gmra.mrb[4].mxu1 %vm1250_vm4, %v4554_v9  ;;  %v1180_v28 = vsel %vm1159_vm2, %v864_v18, %v992_v58 }
 0x1b3   : > { %v994_v31 = vpop.permute.xlu1 %993  ;;  %3566 = vmatpush3.bf16.msra.mxu1 %v3563_v56 }
 0x1b4   : > { %v1104_v51 = vpop.permute.xlu0 %1103  ;;  %3568 = vmatprep.subr.bf16.mxu1 %v3567_v50  ;;  %v1181_v11 = vsel %vm1159_vm2, %v4244_v60, %v994_v31 }
 0x1b5   : > { %v4571_v23 = vsel %vm1192_vm3, %v1180_v28, %v1104_v51 }
 0x1b6   : > { %3273 = vmatprep.mubr.msk.f32.mxu1 %vm1250_vm4, %v4571_v23 }
 0x1b7   : > { %v1106_v26 = vpop.permute.xlu1 %1105  ;;  %3570 = vmatpush3.bf16.msra.mxu1 %v3567_v50 }
 0x1b8   : > { %v4578_v33 = vsel %vm1192_vm3, %v1181_v11, %v1106_v26  ;;  %v996_v6 = vpop.permute.xlu0 %995  ;;  %3572 = vmatprep.subr.bf16.mxu1 %v4568_v38 }
 0x1b9   : > { %3274 = vmatmul.mubr.msk.f32.gmra.mrb[6].mxu1 %vm1250_vm4, %v4578_v33  ;;  %v1182_v24 = vsel %vm1159_vm2, %v865_v47, %v996_v6  ;;  %v783_v47 = vrot.slane %v4368_v59, 7 }
 0x1bb   : > { %v998_v14 = vpop.permute.xlu1 %997  ;;  %v857_v59 = vsel %vm773_vm1, 0.0, %v783_v47 }
 0x1bc   : > { %v1108_v16 = vpop.permute.xlu0 %1107  ;;  %v1183_v57 = vsel %vm1159_vm2, %v4269_v63, %v998_v14 }
 0x1bd   : > { %v4588_v60 = vsel %vm1192_vm3, %v1182_v24, %v1108_v16  ;;  %v2841_v16 = vld [vmem:[%s5177_s4 + $0xd8] sm:$0xff] }
 0x1be   : > { %3276 = vmatprep.mubr.msk.f32.mxu1 %vm1250_vm4, %v4588_v60 }
 0x1bf   : > { %v1110_v52 = vpop.permute.xlu1 %1109 }
 0x1c0   : > { %v4595_v40 = vsel %vm1192_vm3, %v1183_v57, %v1110_v52  ;;  %v1000_v48 = vpop.permute.xlu0 %999  ;;  %v3821_v57 = vmov 0.0  }
 0x1c1   : > { %3277 = vmatmul.mubr.msk.f32.gmra.mrb[8].mxu1 %vm1250_vm4, %v4595_v40  ;;  %v1184_v43 = vsel %vm1159_vm2, %v4283_v61, %v1000_v48 }
 0x1c3   : > { %v1002_v15 = vpop.permute.xlu1 %1001 }
 0x1c4   : > { %v1112_v53 = vpop.permute.xlu0 %1111  ;;  %v1185_v63 = vsel %vm1159_vm2, %v4290_v4, %v1002_v15 }
 0x1c5   : > { %v4602_v55 = vsel %vm1192_vm3, %v1184_v43, %v1112_v53  ;;  %v2842_v53 = vld [vmem:[%s5177_s4 + $0xe0] sm:$0xff] }
 0x1c6   : > { %3279 = vmatprep.mubr.msk.f32.mxu1 %vm1250_vm4, %v4602_v55 }
 0x1c7   : > { %v1114_v49 = vpop.permute.xlu1 %1113 }
 0x1c8   : > { %v4609_v56 = vsel %vm1192_vm3, %v1185_v63, %v1114_v49  ;;  %v1004_v46 = vpop.permute.xlu0 %1003  ;;  %v2843_v63 = vld [vmem:[%s5177_s4 + $0xe8] sm:$0xff] }
 0x1c9   : > { %3280 = vmatmul.mubr.msk.f32.gmra.mrb[10].mxu1 %vm1250_vm4, %v4609_v56  ;;  %v1186_v61 = vsel %vm1159_vm2, %v4311_v21, %v1004_v46 }
 0x1cb   : > { %v1006_v5 = vpop.permute.xlu1 %1005 }
 0x1cc   : > { %v1116_v1 = vpop.permute.xlu0 %1115  ;;  %v1187_v4 = vsel %vm1159_vm2, %v4316_v0, %v1006_v5 }
 0x1cd   : > { %v4616_v8 = vsel %vm1192_vm3, %v1186_v61, %v1116_v1  ;;  %v786_v61 = vrot.slane %v4381_v54, 7  ;;  %v3579_v1 = vpack.c.bf16 %v2843_v63, %v2842_v53  ;;  %v2845_v54 = vld [vmem:[%s5177_s4 + $0xf8] sm:$0xff]  ;;  %v792_v63 = vrot.slane %v4416_v10, 7 }
 0x1ce   : > { %3282 = vmatprep.mubr.msk.f32.mxu1 %vm1250_vm4, %v4616_v8 }
 0x1cf   : > { %v1118_v58 = vpop.permute.xlu1 %1117 }
 0x1d0   : > { %v4623_v50 = vsel %vm1192_vm3, %v1187_v4, %v1118_v58  ;;  %v1008_v13 = vpop.permute.xlu0 %1007 }
 0x1d1   : > { %3283 = vmatmul.mubr.msk.f32.gmra.mrb[12].mxu1 %vm1250_vm4, %v4623_v50  ;;  %v1188_v21 = vsel %vm1159_vm2, %v4325_v12, %v1008_v13  ;;  %v858_v13 = vsel %vm773_vm1, 0.0, %v786_v61 }
 0x1d3   : > { %v1010_v20 = vpop.permute.xlu1 %1009 }
 0x1d4   : > { %v1120_v34 = vpop.permute.xlu0 %1119  ;;  %v1189_v0 = vsel %vm1159_vm2, %v4328_v45, %v1010_v20 }
 0x1d5   : > { %v4630_v18 = vsel %vm1192_vm3, %v1188_v21, %v1120_v34 }
 0x1d6   : > { %3285 = vmatprep.mubr.msk.f32.mxu1 %vm1250_vm4, %v4630_v18 }
 0x1d7   : > { %v1122_v31 = vpop.permute.xlu1 %1121 }
 0x1d8   : > { %v4637_v28 = vsel %vm1192_vm3, %v1189_v0, %v1122_v31  ;;  %v1012_v51 = vpop.permute.xlu0 %1011  ;;  %v2847_v31 = vld [vmem:[%s5177_s4 + $0x108] sm:$0xff] }
 0x1d9   : > { %3286 = vmatmul.mubr.msk.f32.gmra.mrb[14].mxu1 %vm1250_vm4, %v4637_v28  ;;  %v1190_v12 = vsel %vm1159_vm2, %v4337_v62, %v1012_v51  ;;  %v2840_v62 = vld [vmem:[%s5177_s4 + $0xd0] sm:$0xff] }
 0x1da   : > { %v3575_v48 = vpack.c.bf16 %v2841_v16, %v2840_v62  ;;  %v790_v62 = vrot.slane %v4394_v2, 7 }
 0x1db   : > { %v1014_v11 = vpop.permute.xlu1 %1013 }
 0x1dc   : > { %v1124_v26 = vpop.permute.xlu0 %1123  ;;  %v1191_v45 = vsel %vm1159_vm2, %v4340_v41, %v1014_v11  ;;  %v784_v41 = vrot.slane %v4365_v44, 7 }
 0x1dd   : > { %v4644_v6 = vsel %vm1192_vm3, %v1190_v12, %v1124_v26  ;;  %v789_v26 = vrot.slane %v4397_v3, 7  ;;  %v2849_v3 = vld [vmem:[%s5177_s4 + $0x118] sm:$0xff] }
 0x1de   : > { %3288 = vmatprep.mubr.msk.f32.mxu1 %vm1250_vm4, %v4644_v6  ;;  %v785_v49 = vsel %vm773_vm1, %v783_v47, %v784_v41 }
 0x1df   : > { %v1126_v37 = vpop.permute.xlu1 %1125  ;;  %v859_v16 = vsel %vm773_vm1, 0.0, %v789_v26 }
 0x1e0   : > { %v4652_v14 = vsel %vm1192_vm3, %v1191_v45, %v1126_v37  ;;  %v964_v24 = vpop.permute.xlu0 %963 }
 0x1e1   : > { %3289 = vmatmul.mubr.msk.f32.gmra.mrb[16].mxu1 %vm1250_vm4, %v4652_v14  ;;  %v1166_v15 = vsel %vm1159_vm2, %v857_v59, %v964_v24  ;;  %v2848_v24 = vld [vmem:[%s5177_s4 + $0x110] sm:$0xff] }
 0x1e2   : > { %3315 = vmatprep.mubr.f32.mxu1 %v3821_v57 }
 0x1e3   : > { %v966_v52 = vpop.permute.xlu1 %965 }
 0x1e4   : > { %v1076_v43 = vpop.permute.xlu0 %1075  ;;  %v1167_v46 = vsel %vm1159_vm2, %v785_v49, %v966_v52 }
 0x1e5   : > { %v4673_v44 = vsel %vm1192_vm3, %v1166_v15, %v1076_v43  ;;  %3316 = vmatmul.mubr.f32.vlgmr.msra.gmra.mrb[18].mxu1 %v3821_v57  ;;  %v791_v43 = vsel %vm773_vm1, %v789_v26, %v790_v62 }
 0x1e6   : > { %3574 = vmatpush3.bf16.msra.mxu1 %v4568_v38  ;;  %3252 = vmatprep.mubr.msk.f32.mxu0 %vm1250_vm4, %v4673_v44  ;;  %v2844_v38 = vld [vmem:[%s5177_s4 + $0xf0] sm:$0xff] }
 0x1e7   : > { %3318 = vmatprep.mubr.msk.f32.mxu1 %vm1250_vm4, %v4425_v27  ;;  %v1078_v5 = vpop.permute.xlu1 %1077  ;;  %3576 = vmatprep.subr.bf16.mxu1 %v3575_v48  ;;  %v787_v27 = vrot.slane %v4378_v19, 7  ;;  %v3583_v34 = vpack.c.bf16 %v2845_v54, %v2844_v38  ;;  %v2846_v19 = vld [vmem:[%s5177_s4 + $0x100] sm:$0xff] }
 0x1e8   : > { %v4685_v4 = vsel %vm1192_vm3, %v1167_v46, %v1078_v5  ;;  %v968_v58 = vpop.permute.xlu0 %967  ;;  %v3587_v47 = vpack.c.bf16 %v2847_v31, %v2846_v19  ;;  %v793_v5 = vrot.slane %v4413_v25, 7 }
 0x1e9   : > { %3253 = vmatmul.mubr.msk.f32.gmra.mrb[38].mxu0 %vm1250_vm4, %v4685_v4  ;;  %3319 = vmatmul.mubr.msk.f32.gmra.mrb[20].mxu1 %vm1250_vm4, %v4429_v17  ;;  %v1168_v17 = vsel %vm1159_vm2, %v858_v13, %v968_v58  ;;  %v788_v51 = vsel %vm773_vm1, %v786_v61, %v787_v27  ;;  %v860_v61 = vsel %vm773_vm1, 0.0, %v792_v63 }
 0x1ea   : > { %3321 = vmatprep.mubr.msk.f32.mxu1 %vm1250_vm4, %v4451_v7  ;;  %3578 = vmatpush3.bf16.msra.mxu1 %v3575_v48  ;;  %v3591_v48 = vpack.c.bf16 %v2849_v3, %v2848_v24  ;;  %v794_v54 = vsel %vm773_vm1, %v792_v63, %v793_v5 }
 0x1eb   : > { %v970_v20 = vpop.permute.xlu1 %969  ;;  %3580 = vmatprep.subr.bf16.mxu1 %v3579_v1 }
 0x1ec   : > { %v1080_v21 = vpop.permute.xlu0 %1079  ;;  %v1169_v11 = vsel %vm1159_vm2, %v788_v51, %v970_v20 }
 0x1ed   : > { %v4703_v0 = vsel %vm1192_vm3, %v1168_v17, %v1080_v21  ;;  %3322 = vmatmul.mubr.msk.f32.gmra.mrb[22].mxu1 %vm1250_vm4, %v4455_v35 }
 0x1ee   : > { %3255 = vmatprep.mubr.msk.f32.mxu0 %vm1250_vm4, %v4703_v0  ;;  %3324 = vmatprep.mubr.msk.f32.mxu1 %vm1250_vm4, %v4470_v30 }
 0x1ef   : > { %v1082_v12 = vpop.permute.xlu1 %1081  ;;  %3582 = vmatpush3.bf16.msra.mxu1 %v3579_v1 }
 0x1f0   : > { %v4721_v45 = vsel %vm1192_vm3, %v1169_v11, %v1082_v12  ;;  %v972_v37 = vpop.permute.xlu0 %971  ;;  %3584 = vmatprep.subr.bf16.mxu1 %v3583_v34 }
 0x1f1   : > { %3256 = vmatmul.mubr.msk.f32.gmra.mrb[40].mxu0 %vm1250_vm4, %v4721_v45  ;;  %3325 = vmatmul.mubr.msk.f32.gmra.mrb[24].mxu1 %vm1250_vm4, %v4473_v32  ;;  %v1170_v59 = vsel %vm1159_vm2, %v859_v16, %v972_v37 }
 0x1f2   : > { %3327 = vmatprep.mubr.msk.f32.mxu1 %vm1250_vm4, %v4673_v44 }
 0x1f3   : > { %v974_v41 = vpop.permute.xlu1 %973  ;;  %3586 = vmatpush3.bf16.msra.mxu1 %v3583_v34 }
 0x1f4   : > { %v1084_v52 = vpop.permute.xlu0 %1083  ;;  %3588 = vmatprep.subr.bf16.mxu1 %v3587_v47  ;;  %v1171_v2 = vsel %vm1159_vm2, %v791_v43, %v974_v41 }
 0x1f5   : > { %v1203_v15 = vsel %vm1192_vm3, %v1170_v59, %v1084_v52  ;;  %3328 = vmatmul.mubr.msk.f32.gmra.mrb[26].mxu1 %vm1250_vm4, %v4685_v4 }
 0x1f6   : > { %3258 = vmatprep.mubr.msk.f32.mxu0 %vm1250_vm4, %v1203_v15  ;;  %3330 = vmatprep.mubr.msk.f32.mxu1 %vm1250_vm4, %v4703_v0 }
 0x1f7   : > { %v1086_v53 = vpop.permute.xlu1 %1085  ;;  %3590 = vmatpush3.bf16.msra.mxu1 %v3587_v47 }
 0x1f8   : > { %v1204_v49 = vsel %vm1192_vm3, %v1171_v2, %v1086_v53  ;;  %v976_v46 = vpop.permute.xlu0 %975  ;;  %3592 = vmatprep.subr.bf16.mxu1 %v3591_v48 }
 0x1f9   : > { %3259 = vmatmul.mubr.msk.f32.gmra.mrb[42].mxu0 %vm1250_vm4, %v1204_v49  ;;  %3331 = vmatmul.mubr.msk.f32.gmra.mrb[28].mxu1 %vm1250_vm4, %v4721_v45  ;;  %v1172_v10 = vsel %vm1159_vm2, %v860_v61, %v976_v46 }
 0x1fa   : > { %3333 = vmatprep.mubr.msk.f32.mxu1 %vm1250_vm4, %v1203_v15 }
 0x1fb   : > { %v978_v1 = vpop.permute.xlu1 %977  ;;  %3594 = vmatpush3.bf16.msra.mxu1 %v3591_v48 }
 0x1fc   : > { %v1088_v58 = vpop.permute.xlu0 %1087  ;;  %v1173_v25 = vsel %vm1159_vm2, %v794_v54, %v978_v1 }
 0x1fd   : > { %v1205_v38 = vsel %vm1192_vm3, %v1172_v10, %v1088_v58  ;;  %3334 = vmatmul.mubr.msk.f32.gmra.mrb[30].mxu1 %vm1250_vm4, %v1204_v49 }
 0x1fe   : > { %3261 = vmatprep.mubr.msk.f32.mxu0 %vm1250_vm4, %v1205_v38  ;;  %3336 = vmatprep.mubr.msk.f32.mxu1 %vm1250_vm4, %v1205_v38 }
 0x1ff   : > { %v1090_v27 = vpop.permute.xlu1 %1089 }
 0x200   : > { %v1206_v13 = vsel %vm1192_vm3, %v1173_v25, %v1090_v27 }
 0x201   : > { %3262 = vmatmul.mubr.msk.f32.gmra.mrb[44].mxu0 %vm1250_vm4, %v1206_v13  ;;  %3337 = vmatmul.mubr.msk.f32.gmra.mrb[0].mxu1 %vm1250_vm4, %v1206_v13 }
 0x202   : > { %3339 = vmatprep.mubr.msk.f32.mxu1 %vm1250_vm4, %v4492_v22 }
 0x205   : > { %3340 = vmatmul.mubr.msk.f32.gmra.mrb[2].mxu1 %vm1250_vm4, %v4495_v36 }
 0x206   : > { %3342 = vmatprep.mubr.msk.f32.mxu1 %vm1250_vm4, %v4513_v29 }
 0x209   : > { %3343 = vmatmul.mubr.msk.f32.gmra.mrb[4].mxu1 %vm1250_vm4, %v4526_v42 }
 0x20a   : > { %3345 = vmatprep.mubr.msk.f32.mxu1 %vm1250_vm4, %v4541_v39 }
 0x20d   : > { %3346 = vmatmul.mubr.msk.f32.gmra.mrb[6].mxu1 %vm1250_vm4, %v4554_v9 }
 0x20e   : > { %3348 = vmatprep.mubr.msk.f32.mxu1 %vm1250_vm4, %v4571_v23 }
 0x211   : > { %3349 = vmatmul.mubr.msk.f32.gmra.mrb[8].mxu1 %vm1250_vm4, %v4578_v33 }
 0x212   : > { %3351 = vmatprep.mubr.msk.f32.mxu1 %vm1250_vm4, %v4588_v60 }
 0x215   : > { %3352 = vmatmul.mubr.msk.f32.gmra.mrb[10].mxu1 %vm1250_vm4, %v4595_v40 }
 0x216   : > { %3354 = vmatprep.mubr.msk.f32.mxu1 %vm1250_vm4, %v4602_v55 }
 0x219   : > { %3355 = vmatmul.mubr.msk.f32.gmra.mrb[12].mxu1 %vm1250_vm4, %v4609_v56 }
 0x21a   : > { %3357 = vmatprep.mubr.msk.f32.mxu1 %vm1250_vm4, %v4616_v8 }
 0x21d   : > { %3358 = vmatmul.mubr.msk.f32.gmra.mrb[14].mxu1 %vm1250_vm4, %v4623_v50 }
 0x21e   : > { %3360 = vmatprep.mubr.msk.f32.mxu1 %vm1250_vm4, %v4630_v18 }
 0x221   : > { %3361 = vmatmul.mubr.msk.f32.gmra.mrb[16].mxu1 %vm1250_vm4, %v4637_v28 }
 0x222   : > { %3387 = vmatprep.mubr.msk.f32.mxu1 %vm1250_vm4, %v4451_v7  ;;  %v2180_v7 = vld [vmem:[%s5180_s7] sm:$0xff] }
 0x225   : > { %3388 = vmatmul.mubr.msk.f32.vlgmr.msra.gmra.mrb[18].mxu1 %vm1250_vm4, %v4455_v35  ;;  %v2181_v35 = vld [vmem:[%s5180_s7 + $0x8] sm:$0xff] }
 0x226   : > { %3390 = vmatprep.mubr.msk.f32.mxu1 %vm1250_vm4, %v4470_v30  ;;  %v2182_v30 = vld [vmem:[%s5180_s7 + $0x10] sm:$0xff] }
 0x229   : > { %3391 = vmatmul.mubr.msk.f32.gmra.mrb[20].mxu1 %vm1250_vm4, %v4473_v32  ;;  %v3595_v32 = vpack.c.bf16 %v2181_v35, %v2180_v7 }
 0x22a   : > { %3393 = vmatprep.mubr.msk.f32.mxu1 %vm1250_vm4, %v4673_v44 }
 0x22b   : > { %3596 = vmatprep.subr.bf16.mxu0 %v3595_v32 }
 0x22c   : > { %3598 = vmatpush3.bf16.msra.mxu0 %v3595_v32 }
 0x22d   : > { %3394 = vmatmul.mubr.msk.f32.gmra.mrb[22].mxu1 %vm1250_vm4, %v4685_v4  ;;  %v4878_v4 = vld [vmem:[%s5179_s6] ss:$0 sm:$0xff] }
 0x22e   : > { %3396 = vmatprep.mubr.msk.f32.mxu1 %vm1250_vm4, %v4703_v0 }
 0x231   : > { %3397 = vmatmul.mubr.msk.f32.gmra.mrb[24].mxu1 %vm1250_vm4, %v4721_v45 }
 0x232   : > { %3399 = vmatprep.mubr.msk.f32.mxu1 %vm1250_vm4, %v1203_v15 }
 0x235   : > { %3400 = vmatmul.mubr.msk.f32.gmra.mrb[26].mxu1 %vm1250_vm4, %v1204_v49 }
 0x236   : > { %3402 = vmatprep.mubr.msk.f32.mxu1 %vm1250_vm4, %v1205_v38 }
 0x239   : > { %3403 = vmatmul.mubr.msk.f32.gmra.mrb[28].mxu1 %vm1250_vm4, %v1206_v13 }
 0x23a   : > { %3405 = vmatprep.mubr.msk.f32.mxu1 %vm1250_vm4, %v4492_v22  ;;  %v2183_v22 = vld [vmem:[%s5180_s7 + $0x18] sm:$0xff] }
 0x23d   : > { %3406 = vmatmul.mubr.msk.f32.gmra.mrb[30].mxu1 %vm1250_vm4, %v4495_v36 }
 0x23e   : > { %3408 = vmatprep.mubr.msk.f32.mxu1 %vm1250_vm4, %v4513_v29  ;;  %v3599_v29 = vpack.c.bf16 %v2183_v22, %v2182_v30 }
 0x240   : > { %3600 = vmatprep.subr.bf16.mxu0 %v3599_v29 }
 0x241   : > { %3409 = vmatmul.mubr.msk.f32.gmra.mrb[0].mxu1 %vm1250_vm4, %v4526_v42  ;;  %3602 = vmatpush3.bf16.msra.mxu0 %v3599_v29 }
 0x242   : > { %3411 = vmatprep.mubr.msk.f32.mxu1 %vm1250_vm4, %v4541_v39 }
 0x245   : > { %3412 = vmatmul.mubr.msk.f32.gmra.mrb[2].mxu1 %vm1250_vm4, %v4554_v9 }
 0x246   : > { %3414 = vmatprep.mubr.msk.f32.mxu1 %vm1250_vm4, %v4571_v23 }
 0x249   : > { %3415 = vmatmul.mubr.msk.f32.gmra.mrb[4].mxu1 %vm1250_vm4, %v4578_v33 }
 0x24a   : > { %3417 = vmatprep.mubr.msk.f32.mxu1 %vm1250_vm4, %v4588_v60 }
 0x24d   : > { %3418 = vmatmul.mubr.msk.f32.gmra.mrb[6].mxu1 %vm1250_vm4, %v4595_v40 }
 0x24e   : > { %3420 = vmatprep.mubr.msk.f32.mxu1 %vm1250_vm4, %v4602_v55 }
 0x251   : > { %3421 = vmatmul.mubr.msk.f32.gmra.mrb[8].mxu1 %vm1250_vm4, %v4609_v56 }
 0x252   : > { %3423 = vmatprep.mubr.msk.f32.mxu1 %vm1250_vm4, %v4616_v8 }
 0x255   : > { %3424 = vmatmul.mubr.msk.f32.gmra.mrb[10].mxu1 %vm1250_vm4, %v4623_v50 }
 0x256   : > { %3426 = vmatprep.mubr.msk.f32.mxu1 %vm1250_vm4, %v4630_v18 }
 0x257   : > { %v3245_v36 = vpop.f32.mrb[32].mxu0 }
 0x258   : > { %v1413_v42 = vpop.f32.mrb[33].mxu0 }
 0x259   : > { %3427 = vmatmul.mubr.msk.f32.gmra.mrb[12].mxu1 %vm1250_vm4, %v4637_v28 }
 0x25a   : > { %3429 = vmatprep.mubr.msk.f32.mxu1 %vm1250_vm4, %v4644_v6 }
 0x25d   : > { %3430 = vmatmul.mubr.msk.f32.gmra.mrb[14].mxu1 %vm1250_vm4, %v4652_v14  ;;  %v4873_v14 = vld [vmem:[%s5178_s5] ss:$0 sm:$0xff] }
 0x25e   : > { %3432 = vmatprep.mubr.f32.mxu1 %v3821_v57 }
 0x25f   : > { %v3248_v39 = vpop.f32.mrb[34].mxu0 }
 0x260   : > { %v1423_v9 = vpop.f32.mrb[35].mxu0 }
 0x261   : > { %3433 = vmatmul.mubr.f32.gmra.mrb[16].mxu1 %v3821_v57 }
 0x267   : > { %v3251_v23 = vpop.f32.mrb[36].mxu0 }
 0x268   : > { %v1433_v33 = vpop.f32.mrb[37].mxu0 }
 0x2bc   : > { %v3254_v60 = vpop.f32.mrb[38].mxu0 }
 0x2bd   : > { %v1443_v40 = vpop.f32.mrb[39].mxu0 }
 0x2c4   : > { %v3257_v55 = vpop.f32.mrb[40].mxu0 }
 0x2c5   : > { %v1453_v56 = vpop.f32.mrb[41].mxu0 }
 0x2cc   : > { %v3260_v8 = vpop.f32.mrb[42].mxu0 }
 0x2cd   : > { %v1463_v50 = vpop.f32.mrb[43].mxu0 }
 0x2d4   : > { %v4866_v18 = vpop.f32.mrb[44].mxu0 }
 0x2d5   : > { %v4868_v28 = vpop.f32.mrb[45].mxu0 }
 0x2f8   : > { %v3389_v6 = vpop.f32.mrb[18].mxu1 }
 0x2f9   : > { %v3615_v44 = vadd.f32 %v3389_v6, %v3245_v36  ;;  %v1879_v57 = vpop.f32.mrb[19].mxu1 }
 0x2fa   : > { %v3616_v20 = vadd.f32 %v1879_v57, %v1413_v42 }
 0x2fb   : > { %v2078_v17 = vmul.f32 %v3615_v44, %v4873_v14 }
 0x2fc   : > { %v2077_v21 = vmul.f32 %v3616_v20, %v4873_v14  ;;  %v3392_v34 = vpop.f32.mrb[20].mxu1 }
 0x2fd   : > { %v2117_v0 = vadd.f32 %v4878_v4, %v2078_v17  ;;  %v3617_v19 = vadd.f32 %v3392_v34, %v3248_v39  ;;  %v1889_v31 = vpop.f32.mrb[21].mxu1 }
 0x2fe   : > { %v2116_v51 = vadd.f32 %v4878_v4, %v2077_v21  ;;  %v3618_v11 = vadd.f32 %v1889_v31, %v1423_v9 }
 0x2ff   : > { %v2080_v12 = vmul.f32 %v3617_v19, %v4873_v14  ;;  %v2149_v47 = vmax.f32 %v2117_v0, 0.0 }
 0x300   : > { %v2148_v26 = vmax.f32 %v2116_v51, 0.0  ;;  %v2079_v45 = vmul.f32 %v3618_v11, %v4873_v14  ;;  %v3395_v37 = vpop.f32.mrb[22].mxu1 }
 0x301   : > { %v2119_v24 = vadd.f32 %v4878_v4, %v2080_v12  ;;  %v3619_v3 = vadd.f32 %v3395_v37, %v3251_v23  ;;  %v1899_v62 = vpop.f32.mrb[23].mxu1 }
 0x302   : > { %v2118_v16 = vadd.f32 %v4878_v4, %v2079_v45  ;;  %v3620_v41 = vadd.f32 %v1899_v62, %v1433_v33  ;;  %3443 = vmatprep.mubr.msk.f32.mxu0 %vm1159_vm2, %v2148_v26 }
 0x303   : > { %v2082_v59 = vmul.f32 %v3619_v3, %v4873_v14  ;;  %3444 = vmatmul.mubr.msk.f32.vlgmr.msra.gmra.mrb[46].mxu0 %vm1159_vm2, %v2149_v47  ;;  %v2151_v43 = vmax.f32 %v2119_v24, 0.0 }
 0x304   : > { %v2150_v52 = vmax.f32 %v2118_v16, 0.0  ;;  %v2081_v48 = vmul.f32 %v3620_v41, %v4873_v14  ;;  %v3398_v15 = vpop.f32.mrb[24].mxu1 }
 0x305   : > { %v2121_v2 = vadd.f32 %v4878_v4, %v2082_v59  ;;  %v3621_v53 = vadd.f32 %v3398_v15, %v3254_v60  ;;  %v1909_v63 = vpop.f32.mrb[25].mxu1 }
 0x306   : > { %v2120_v49 = vadd.f32 %v4878_v4, %v2081_v48  ;;  %v3622_v46 = vadd.f32 %v1909_v63, %v1443_v40  ;;  %3446 = vmatprep.mubr.msk.f32.mxu0 %vm1159_vm2, %v2150_v52 }
 0x307   : > { %v2084_v5 = vmul.f32 %v3621_v53, %v4873_v14  ;;  %3447 = vmatmul.mubr.msk.f32.gmra.mrb[48].mxu0 %vm1159_vm2, %v2151_v43  ;;  %v2153_v58 = vmax.f32 %v2121_v2, 0.0 }
 0x308   : > { %v2152_v61 = vmax.f32 %v2120_v49, 0.0  ;;  %v2083_v1 = vmul.f32 %v3622_v46, %v4873_v14  ;;  %v3401_v10 = vpop.f32.mrb[26].mxu1 }
 0x309   : > { %v2123_v38 = vadd.f32 %v4878_v4, %v2084_v5  ;;  %v3623_v54 = vadd.f32 %v3401_v10, %v3257_v55  ;;  %v1919_v25 = vpop.f32.mrb[27].mxu1 }
 0x30a   : > { %v2122_v27 = vadd.f32 %v4878_v4, %v2083_v1  ;;  %v3624_v13 = vadd.f32 %v1919_v25, %v1453_v56  ;;  %3449 = vmatprep.mubr.msk.f32.mxu0 %vm1159_vm2, %v2152_v61 }
 0x30b   : > { %v2086_v7 = vmul.f32 %v3623_v54, %v4873_v14  ;;  %3450 = vmatmul.mubr.msk.f32.gmra.mrb[50].mxu0 %vm1159_vm2, %v2153_v58  ;;  %v2155_v22 = vmax.f32 %v2123_v38, 0.0 }
 0x30c   : > { %v2154_v35 = vmax.f32 %v2122_v27, 0.0  ;;  %v2085_v30 = vmul.f32 %v3624_v13, %v4873_v14  ;;  %v3404_v32 = vpop.f32.mrb[28].mxu1 }
 0x30d   : > { %v2125_v36 = vadd.f32 %v4878_v4, %v2086_v7  ;;  %v3625_v29 = vadd.f32 %v3404_v32, %v3260_v8  ;;  %v1929_v42 = vpop.f32.mrb[29].mxu1 }
 0x30e   : > { %v2124_v39 = vadd.f32 %v4878_v4, %v2085_v30  ;;  %v3626_v9 = vadd.f32 %v1929_v42, %v1463_v50  ;;  %3452 = vmatprep.mubr.msk.f32.mxu0 %vm1159_vm2, %v2154_v35 }
 0x30f   : > { %v2088_v23 = vmul.f32 %v3625_v29, %v4873_v14  ;;  %3453 = vmatmul.mubr.msk.f32.gmra.mrb[52].mxu0 %vm1159_vm2, %v2155_v22  ;;  %v2157_v55 = vmax.f32 %v2125_v36, 0.0 }
 0x310   : > { %v2156_v33 = vmax.f32 %v2124_v39, 0.0  ;;  %v2087_v60 = vmul.f32 %v3626_v9, %v4873_v14  ;;  %v3407_v40 = vpop.f32.mrb[30].mxu1 }
 0x311   : > { %v2127_v56 = vadd.f32 %v4878_v4, %v2088_v23  ;;  %v3627_v6 = vadd.f32 %v3407_v40, %v4866_v18  ;;  %v1939_v8 = vpop.f32.mrb[31].mxu1 }
 0x312   : > { %v2126_v44 = vadd.f32 %v4878_v4, %v2087_v60  ;;  %v3628_v50 = vadd.f32 %v1939_v8, %v4868_v28  ;;  %3455 = vmatprep.mubr.msk.f32.mxu0 %vm1159_vm2, %v2156_v33 }
 0x313   : > { %v2090_v57 = vmul.f32 %v3627_v6, %v4873_v14  ;;  %3456 = vmatmul.mubr.msk.f32.gmra.mrb[54].mxu0 %vm1159_vm2, %v2157_v55  ;;  %v2159_v34 = vmax.f32 %v2127_v56, 0.0 }
 0x314   : > { %v2158_v20 = vmax.f32 %v2126_v44, 0.0  ;;  %v2089_v17 = vmul.f32 %v3628_v50, %v4873_v14  ;;  %v3410_v21 = vpop.f32.mrb[0].mxu1 }
 0x315   : > { %v2129_v0 = vadd.f32 %v4878_v4, %v2090_v57  ;;  %v2092_v18 = vmul.f32 %v3410_v21, %v4873_v14  ;;  %v1949_v19 = vpop.f32.mrb[1].mxu1 }
 0x316   : > { %v2128_v31 = vadd.f32 %v4878_v4, %v2089_v17  ;;  %v2091_v28 = vmul.f32 %v4873_v14, %v1949_v19  ;;  %3458 = vmatprep.mubr.msk.f32.mxu0 %vm1159_vm2, %v2158_v20 }
 0x317   : > { %3459 = vmatmul.mubr.msk.f32.gmra.mrb[56].mxu0 %vm1159_vm2, %v2159_v34  ;;  %v2161_v26 = vmax.f32 %v2129_v0, 0.0  ;;  %v2131_v45 = vadd.f32 %v4878_v4, %v2092_v18 }
 0x318   : > { %v2160_v51 = vmax.f32 %v2128_v31, 0.0  ;;  %v2130_v11 = vadd.f32 %v4878_v4, %v2091_v28  ;;  %v3413_v12 = vpop.f32.mrb[2].mxu1 }
 0x319   : > { %v2094_v37 = vmul.f32 %v3413_v12, %v4873_v14  ;;  %v1959_v47 = vpop.f32.mrb[3].mxu1  ;;  %v2163_v41 = vmax.f32 %v2131_v45, 0.0 }
 0x31a   : > { %v2162_v24 = vmax.f32 %v2130_v11, 0.0  ;;  %v2093_v3 = vmul.f32 %v4873_v14, %v1959_v47  ;;  %3461 = vmatprep.mubr.msk.f32.mxu0 %vm1159_vm2, %v2160_v51 }
 0x31b   : > { %3462 = vmatmul.mubr.msk.f32.gmra.mrb[58].mxu0 %vm1159_vm2, %v2161_v26  ;;  %v2133_v59 = vadd.f32 %v4878_v4, %v2094_v37 }
 0x31c   : > { %v2132_v62 = vadd.f32 %v4878_v4, %v2093_v3  ;;  %v3416_v16 = vpop.f32.mrb[4].mxu1  ;;  %3464 = vmatprep.mubr.msk.f32.mxu0 %vm1159_vm2, %v2162_v24 }
 0x31d   : > { %v2096_v52 = vmul.f32 %v3416_v16, %v4873_v14  ;;  %v1969_v48 = vpop.f32.mrb[5].mxu1  ;;  %v2165_v63 = vmax.f32 %v2133_v59, 0.0 }
 0x31e   : > { %v2164_v15 = vmax.f32 %v2132_v62, 0.0  ;;  %v2095_v43 = vmul.f32 %v4873_v14, %v1969_v48 }
 0x31f   : > { %3465 = vmatmul.mubr.msk.f32.gmra.mrb[60].mxu0 %vm1159_vm2, %v2163_v41  ;;  %v2135_v49 = vadd.f32 %v4878_v4, %v2096_v52 }
 0x320   : > { %v2134_v2 = vadd.f32 %v4878_v4, %v2095_v43  ;;  %v3419_v53 = vpop.f32.mrb[6].mxu1  ;;  %3467 = vmatprep.mubr.msk.f32.mxu0 %vm1159_vm2, %v2164_v15  ;;  %v3723_v15 = vld [vmem:[%s3951_s30 + $0x8] sm:$0xff] }
 0x321   : > { %v2098_v46 = vmul.f32 %v3419_v53, %v4873_v14  ;;  %v1979_v5 = vpop.f32.mrb[7].mxu1  ;;  %v2167_v38 = vmax.f32 %v2135_v49, 0.0 }
 0x322   : > { %v2166_v61 = vmax.f32 %v2134_v2, 0.0  ;;  %v2097_v1 = vmul.f32 %v4873_v14, %v1979_v5 }
 0x323   : > { %3468 = vmatmul.mubr.msk.f32.gmra.mrb[62].mxu0 %vm1159_vm2, %v2165_v63  ;;  %v2137_v54 = vadd.f32 %v4878_v4, %v2098_v46  ;;  %v3724_v63 = vld [vmem:[%s3951_s30] sm:$0xff] }
 0x324   : > { %v2136_v10 = vadd.f32 %v4878_v4, %v2097_v1  ;;  %v3422_v58 = vpop.f32.mrb[8].mxu1  ;;  %3470 = vmatprep.mubr.msk.f32.mxu0 %vm1159_vm2, %v2166_v61 }
 0x325   : > { %v2100_v25 = vmul.f32 %v3422_v58, %v4873_v14  ;;  %v1989_v27 = vpop.f32.mrb[9].mxu1  ;;  %v2169_v32 = vmax.f32 %v2137_v54, 0.0 }
 0x326   : > { %v2168_v13 = vmax.f32 %v2136_v10, 0.0  ;;  %v2099_v7 = vmul.f32 %v4873_v14, %v1989_v27 }
 0x327   : > { %3471 = vmatmul.mubr.msk.f32.gmra.mrb[64].mxu0 %vm1159_vm2, %v2167_v38  ;;  %v2139_v22 = vadd.f32 %v4878_v4, %v2100_v25  ;;  %v3725_v38 = vld [vmem:[%s3951_s30 + $0x18] sm:$0xff] }
 0x328   : > { %v2138_v35 = vadd.f32 %v4878_v4, %v2099_v7  ;;  %v3425_v30 = vpop.f32.mrb[10].mxu1  ;;  %3473 = vmatprep.mubr.msk.f32.mxu0 %vm1159_vm2, %v2168_v13  ;;  %v3726_v13 = vld [vmem:[%s3951_s30 + $0x10] sm:$0xff] }
 0x329   : > { %v2102_v36 = vmul.f32 %v3425_v30, %v4873_v14  ;;  %v1999_v29 = vpop.f32.mrb[11].mxu1  ;;  %v2171_v33 = vmax.f32 %v2139_v22, 0.0 }
 0x32a   : > { %v2170_v42 = vmax.f32 %v2138_v35, 0.0  ;;  %v2101_v39 = vmul.f32 %v4873_v14, %v1999_v29 }
 0x32b   : > { %3474 = vmatmul.mubr.msk.f32.gmra.mrb[66].mxu0 %vm1159_vm2, %v2169_v32  ;;  %v2141_v60 = vadd.f32 %v4878_v4, %v2102_v36 }
 0x32c   : > { %v2140_v9 = vadd.f32 %v4878_v4, %v2101_v39  ;;  %v3428_v23 = vpop.f32.mrb[12].mxu1  ;;  %3476 = vmatprep.mubr.msk.f32.mxu0 %vm1159_vm2, %v2170_v42  ;;  %v3727_v42 = vld [vmem:[%s3951_s30 + $0x28] sm:$0xff] }
 0x32d   : > { %v2104_v40 = vmul.f32 %v3428_v23, %v4873_v14  ;;  %v2009_v55 = vpop.f32.mrb[13].mxu1  ;;  %v2173_v50 = vmax.f32 %v2141_v60, 0.0 }
 0x32e   : > { %v2172_v56 = vmax.f32 %v2140_v9, 0.0  ;;  %v2103_v6 = vmul.f32 %v4873_v14, %v2009_v55 }
 0x32f   : > { %3477 = vmatmul.mubr.msk.f32.gmra.mrb[68].mxu0 %vm1159_vm2, %v2171_v33  ;;  %v2143_v57 = vadd.f32 %v4878_v4, %v2104_v40  ;;  %v3728_v33 = vld [vmem:[%s3951_s30 + $0x20] sm:$0xff] }
 0x330   : > { %v2142_v8 = vadd.f32 %v4878_v4, %v2103_v6  ;;  %v3431_v44 = vpop.f32.mrb[14].mxu1  ;;  %3479 = vmatprep.mubr.msk.f32.mxu0 %vm1159_vm2, %v2172_v56 }
 0x331   : > { %v2106_v20 = vmul.f32 %v3431_v44, %v4873_v14  ;;  %v2019_v17 = vpop.f32.mrb[15].mxu1  ;;  %v2175_v19 = vmax.f32 %v2143_v57, 0.0 }
 0x332   : > { %v2174_v21 = vmax.f32 %v2142_v8, 0.0  ;;  %v2105_v34 = vmul.f32 %v4873_v14, %v2019_v17 }
 0x333   : > { %3480 = vmatmul.mubr.msk.f32.gmra.mrb[70].mxu0 %vm1159_vm2, %v2173_v50  ;;  %v2145_v31 = vadd.f32 %v4878_v4, %v2106_v20  ;;  %v3729_v50 = vld [vmem:[%s3951_s30 + $0x38] sm:$0xff] }
 0x334   : > { %v2144_v0 = vadd.f32 %v4878_v4, %v2105_v34  ;;  %v3434_v18 = vpop.f32.mrb[16].mxu1  ;;  %3482 = vmatprep.mubr.msk.f32.mxu0 %vm1159_vm2, %v2174_v21  ;;  %v3730_v21 = vld [vmem:[%s3951_s30 + $0x30] sm:$0xff] }
 0x335   : > { %v2108_v28 = vmul.f32 %v3434_v18, %v4873_v14  ;;  %v2029_v51 = vpop.f32.mrb[17].mxu1  ;;  %v2177_v45 = vmax.f32 %v2145_v31, 0.0 }
 0x336   : > { %v2176_v11 = vmax.f32 %v2144_v0, 0.0  ;;  %v2107_v12 = vmul.f32 %v4873_v14, %v2029_v51  ;;  %v4981_v14 = vld [vmem:[%s5181_s8] ss:$0 sm:$0xff] }
 0x337   : > { %3483 = vmatmul.mubr.msk.f32.gmra.mrb[72].mxu0 %vm1159_vm2, %v2175_v19  ;;  %v2147_v37 = vadd.f32 %v4878_v4, %v2108_v28 }
 0x338   : > { %v2146_v26 = vadd.f32 %v4878_v4, %v2107_v12  ;;  %3485 = vmatprep.mubr.msk.f32.mxu0 %vm1159_vm2, %v2176_v11  ;;  %v4987_v4 = vld [vmem:[%s5182_s9] ss:$0 sm:$0xff]  ;;  %v3731_v11 = vld [vmem:[%s3951_s30 + $0x48] sm:$0xff] }
 0x339   : > { %v2179_v24 = vmax.f32 %v2147_v37, 0.0  ;;  %v3732_v37 = vld [vmem:[%s3951_s30 + $0x40] sm:$0xff] }
 0x33a   : > { %v2178_v47 = vmax.f32 %v2146_v26, 0.0 }
 0x33b   : > { %3486 = vmatmul.mubr.msk.f32.gmra.mrb[74].mxu0 %vm1159_vm2, %v2177_v45 }
 0x33c   : > { %3488 = vmatprep.mubr.msk.f32.mxu0 %vm1159_vm2, %v2178_v47 }
 0x33f   : > { %3489 = vmatmul.mubr.msk.f32.gmra.mrb[76].mxu0 %vm1159_vm2, %v2179_v24 }
 0x3d6   : > { %v3445_v3 = vpop.f32.mrb[46].mxu0 }
 0x3d7   : > { %v2513_v62 = vmul.f32 %v3445_v3, %v4981_v14  ;;  %v2346_v16 = vpop.f32.mrb[47].mxu0 }
 0x3d8   : > { %v2512_v41 = vmul.f32 %v4981_v14, %v2346_v16 }
 0x3d9   : > { %v2552_v59 = vadd.f32 %v4987_v4, %v2513_v62 }
 0x3da   : > { %v2551_v52 = vadd.f32 %v4987_v4, %v2512_v41  ;;  %v3448_v48 = vpop.f32.mrb[48].mxu0 }
 0x3db   : > { %v2584_v43 = vadd.f32 %v3723_v15, %v2552_v59  ;;  %v2515_v2 = vmul.f32 %v3448_v48, %v4981_v14  ;;  %v2356_v53 = vpop.f32.mrb[49].mxu0 }
 0x3dc   : > { %v2583_v49 = vadd.f32 %v3724_v63, %v2551_v52  ;;  %v2514_v46 = vmul.f32 %v4981_v14, %v2356_v53  ;;  %v3733_v52 = vld [vmem:[%s3951_s30 + $0x58] sm:$0xff] }
 0x3dd   : > { %v2616_v5 = vmax.f32 %v2584_v43, 0.0  ;;  %v2554_v61 = vadd.f32 %v4987_v4, %v2515_v2  ;;  %v3734_v2 = vld [vmem:[%s3951_s30 + $0x50] sm:$0xff] }
 0x3de   : > { %v2615_v1 = vmax.f32 %v2583_v49, 0.0  ;;  %v2553_v10 = vadd.f32 %v4987_v4, %v2514_v46  ;;  %v3451_v58 = vpop.f32.mrb[50].mxu0 }
 0x3df   : > { %2648 = vst [vmem:[%s5001_s26 + $0x8] sm:$0xff] %v2616_v5  ;;  %v2586_v54 = vadd.f32 %v3725_v38, %v2554_v61  ;;  %v2517_v25 = vmul.f32 %v3451_v58, %v4981_v14  ;;  %v2366_v27 = vpop.f32.mrb[51].mxu0 }
 0x3e0   : > { %2647 = vst [vmem:[%s5001_s26] sm:$0xff] %v2615_v1  ;;  %v2585_v7 = vadd.f32 %v3726_v13, %v2553_v10  ;;  %v2516_v35 = vmul.f32 %v4981_v14, %v2366_v27  ;;  %v3735_v10 = vld [vmem:[%s3951_s30 + $0x68] sm:$0xff] }
 0x3e1   : > { %v2618_v30 = vmax.f32 %v2586_v54, 0.0  ;;  %v2556_v32 = vadd.f32 %v4987_v4, %v2517_v25  ;;  %v3736_v25 = vld [vmem:[%s3951_s30 + $0x60] sm:$0xff] }
 0x3e2   : > { %v2617_v22 = vmax.f32 %v2585_v7, 0.0  ;;  %v2555_v36 = vadd.f32 %v4987_v4, %v2516_v35  ;;  %v3454_v29 = vpop.f32.mrb[52].mxu0 }
 0x3e3   : > { %2650 = vst [vmem:[%s5001_s26 + $0x18] sm:$0xff] %v2618_v30  ;;  %v2588_v39 = vadd.f32 %v3727_v42, %v2556_v32  ;;  %v2519_v9 = vmul.f32 %v3454_v29, %v4981_v14  ;;  %v2376_v23 = vpop.f32.mrb[53].mxu0 }
 0x3e4   : > { %2649 = vst [vmem:[%s5001_s26 + $0x10] sm:$0xff] %v2617_v22  ;;  %v2587_v60 = vadd.f32 %v3728_v33, %v2555_v36  ;;  %v2518_v40 = vmul.f32 %v4981_v14, %v2376_v23  ;;  %v3737_v36 = vld [vmem:[%s3951_s30 + $0x78] sm:$0xff] }
 0x3e5   : > { %v2620_v55 = vmax.f32 %v2588_v39, 0.0  ;;  %v2558_v56 = vadd.f32 %v4987_v4, %v2519_v9  ;;  %v3738_v9 = vld [vmem:[%s3951_s30 + $0x70] sm:$0xff] }
 0x3e6   : > { %v2619_v6 = vmax.f32 %v2587_v60, 0.0  ;;  %v2557_v8 = vadd.f32 %v4987_v4, %v2518_v40  ;;  %v3457_v44 = vpop.f32.mrb[54].mxu0 }
 0x3e7   : > { %2652 = vst [vmem:[%s5001_s26 + $0x28] sm:$0xff] %v2620_v55  ;;  %v2590_v57 = vadd.f32 %v3729_v50, %v2558_v56  ;;  %v2521_v20 = vmul.f32 %v3457_v44, %v4981_v14  ;;  %v2386_v17 = vpop.f32.mrb[55].mxu0 }
 0x3e8   : > { %2651 = vst [vmem:[%s5001_s26 + $0x20] sm:$0xff] %v2619_v6  ;;  %v2589_v34 = vadd.f32 %v3730_v21, %v2557_v8  ;;  %v2520_v0 = vmul.f32 %v4981_v14, %v2386_v17  ;;  %v3739_v8 = vld [vmem:[%s3951_s30 + $0x88] sm:$0xff] }
 0x3e9   : > { %v2622_v18 = vmax.f32 %v2590_v57, 0.0  ;;  %v2560_v19 = vadd.f32 %v4987_v4, %v2521_v20  ;;  %v3740_v20 = vld [vmem:[%s3951_s30 + $0x80] sm:$0xff] }
 0x3ea   : > { %v2621_v31 = vmax.f32 %v2589_v34, 0.0  ;;  %v2559_v28 = vadd.f32 %v4987_v4, %v2520_v0  ;;  %v3460_v51 = vpop.f32.mrb[56].mxu0 }
 0x3eb   : > { %2654 = vst [vmem:[%s5001_s26 + $0x38] sm:$0xff] %v2622_v18  ;;  %v2592_v12 = vadd.f32 %v3731_v11, %v2560_v19  ;;  %v2523_v26 = vmul.f32 %v3460_v51, %v4981_v14  ;;  %v2396_v45 = vpop.f32.mrb[57].mxu0 }
 0x3ec   : > { %2653 = vst [vmem:[%s5001_s26 + $0x30] sm:$0xff] %v2621_v31  ;;  %v2591_v47 = vadd.f32 %v3732_v37, %v2559_v28  ;;  %v2522_v24 = vmul.f32 %v4981_v14, %v2396_v45  ;;  %v3741_v28 = vld [vmem:[%s3951_s30 + $0x98] sm:$0xff] }
 0x3ed   : > { %v2624_v3 = vmax.f32 %v2592_v12, 0.0  ;;  %v2562_v62 = vadd.f32 %v4987_v4, %v2523_v26  ;;  %v3742_v26 = vld [vmem:[%s3951_s30 + $0x90] sm:$0xff] }
 0x3ee   : > { %v2623_v16 = vmax.f32 %v2591_v47, 0.0  ;;  %v2561_v41 = vadd.f32 %v4987_v4, %v2522_v24  ;;  %v3463_v59 = vpop.f32.mrb[58].mxu0 }
 0x3ef   : > { %2656 = vst [vmem:[%s5001_s26 + $0x48] sm:$0xff] %v2624_v3  ;;  %v2594_v48 = vadd.f32 %v3733_v52, %v2562_v62  ;;  %v2525_v15 = vmul.f32 %v3463_v59, %v4981_v14  ;;  %v2406_v43 = vpop.f32.mrb[59].mxu0 }
 0x3f0   : > { %2655 = vst [vmem:[%s5001_s26 + $0x40] sm:$0xff] %v2623_v16  ;;  %v2593_v53 = vadd.f32 %v3734_v2, %v2561_v41  ;;  %v2524_v63 = vmul.f32 %v4981_v14, %v2406_v43  ;;  %v3743_v41 = vld [vmem:[%s3951_s30 + $0xa8] sm:$0xff] }
 0x3f1   : > { %v2626_v49 = vmax.f32 %v2594_v48, 0.0  ;;  %v2564_v46 = vadd.f32 %v4987_v4, %v2525_v15  ;;  %v3744_v15 = vld [vmem:[%s3951_s30 + $0xa0] sm:$0xff] }
 0x3f2   : > { %v2625_v5 = vmax.f32 %v2593_v53, 0.0  ;;  %v2563_v61 = vadd.f32 %v4987_v4, %v2524_v63  ;;  %v3466_v1 = vpop.f32.mrb[60].mxu0 }
 0x3f3   : > { %2658 = vst [vmem:[%s5001_s26 + $0x58] sm:$0xff] %v2626_v49  ;;  %v2596_v58 = vadd.f32 %v3735_v10, %v2564_v46  ;;  %v2527_v38 = vmul.f32 %v3466_v1, %v4981_v14  ;;  %v2416_v54 = vpop.f32.mrb[61].mxu0 }
 0x3f4   : > { %2657 = vst [vmem:[%s5001_s26 + $0x50] sm:$0xff] %v2625_v5  ;;  %v2595_v27 = vadd.f32 %v3736_v25, %v2563_v61  ;;  %v2526_v13 = vmul.f32 %v4981_v14, %v2416_v54  ;;  %v3745_v61 = vld [vmem:[%s3951_s30 + $0xb8] sm:$0xff] }
 0x3f5   : > { %v2628_v7 = vmax.f32 %v2596_v58, 0.0  ;;  %v2566_v35 = vadd.f32 %v4987_v4, %v2527_v38  ;;  %v3746_v38 = vld [vmem:[%s3951_s30 + $0xb0] sm:$0xff] }
 0x3f6   : > { %v2627_v30 = vmax.f32 %v2595_v27, 0.0  ;;  %v2565_v32 = vadd.f32 %v4987_v4, %v2526_v13  ;;  %v3469_v22 = vpop.f32.mrb[62].mxu0 }
 0x3f7   : > { %2660 = vst [vmem:[%s5001_s26 + $0x68] sm:$0xff] %v2628_v7  ;;  %v2598_v29 = vadd.f32 %v3737_v36, %v2566_v35  ;;  %v2529_v42 = vmul.f32 %v3469_v22, %v4981_v14  ;;  %v2426_v39 = vpop.f32.mrb[63].mxu0 }
 0x3f8   : > { %2659 = vst [vmem:[%s5001_s26 + $0x60] sm:$0xff] %v2627_v30  ;;  %v2597_v23 = vadd.f32 %v3738_v9, %v2565_v32  ;;  %v2528_v33 = vmul.f32 %v4981_v14, %v2426_v39  ;;  %v3747_v32 = vld [vmem:[%s3951_s30 + $0xc8] sm:$0xff] }
 0x3f9   : > { %v2630_v60 = vmax.f32 %v2598_v29, 0.0  ;;  %v2568_v40 = vadd.f32 %v4987_v4, %v2529_v42  ;;  %v3748_v42 = vld [vmem:[%s3951_s30 + $0xc0] sm:$0xff] }
 0x3fa   : > { %v2629_v55 = vmax.f32 %v2597_v23, 0.0  ;;  %v2567_v56 = vadd.f32 %v4987_v4, %v2528_v33  ;;  %v3472_v6 = vpop.f32.mrb[64].mxu0 }
 0x3fb   : > { %2662 = vst [vmem:[%s5001_s26 + $0x78] sm:$0xff] %v2630_v60  ;;  %v2600_v44 = vadd.f32 %v3739_v8, %v2568_v40  ;;  %v2531_v50 = vmul.f32 %v3472_v6, %v4981_v14  ;;  %v2436_v57 = vpop.f32.mrb[65].mxu0 }
 0x3fc   : > { %2661 = vst [vmem:[%s5001_s26 + $0x70] sm:$0xff] %v2629_v55  ;;  %v2599_v17 = vadd.f32 %v3740_v20, %v2567_v56  ;;  %v2530_v21 = vmul.f32 %v4981_v14, %v2436_v57  ;;  %v3749_v56 = vld [vmem:[%s3951_s30 + $0xd8] sm:$0xff] }
 0x3fd   : > { %v2632_v34 = vmax.f32 %v2600_v44, 0.0  ;;  %v2570_v0 = vadd.f32 %v4987_v4, %v2531_v50  ;;  %v3750_v50 = vld [vmem:[%s3951_s30 + $0xd0] sm:$0xff] }
 0x3fe   : > { %v2631_v18 = vmax.f32 %v2599_v17, 0.0  ;;  %v2569_v19 = vadd.f32 %v4987_v4, %v2530_v21  ;;  %v3475_v31 = vpop.f32.mrb[66].mxu0 }
 0x3ff   : > { %2664 = vst [vmem:[%s5001_s26 + $0x88] sm:$0xff] %v2632_v34  ;;  %v2602_v51 = vadd.f32 %v3741_v28, %v2570_v0  ;;  %v2533_v11 = vmul.f32 %v3475_v31, %v4981_v14  ;;  %v2446_v12 = vpop.f32.mrb[67].mxu0 }
 0x400   : > { %2663 = vst [vmem:[%s5001_s26 + $0x80] sm:$0xff] %v2631_v18  ;;  %v2601_v45 = vadd.f32 %v3742_v26, %v2569_v19  ;;  %v2532_v37 = vmul.f32 %v4981_v14, %v2446_v12  ;;  %v3751_v19 = vld [vmem:[%s3951_s30 + $0xe8] sm:$0xff] }
 0x401   : > { %v2634_v47 = vmax.f32 %v2602_v51, 0.0  ;;  %v2572_v24 = vadd.f32 %v4987_v4, %v2533_v11  ;;  %v3752_v11 = vld [vmem:[%s3951_s30 + $0xe0] sm:$0xff] }
 0x402   : > { %v2633_v3 = vmax.f32 %v2601_v45, 0.0  ;;  %v2571_v62 = vadd.f32 %v4987_v4, %v2532_v37  ;;  %v3478_v16 = vpop.f32.mrb[68].mxu0 }
 0x403   : > { %2666 = vst [vmem:[%s5001_s26 + $0x98] sm:$0xff] %v2634_v47  ;;  %v2604_v59 = vadd.f32 %v3743_v41, %v2572_v24  ;;  %v2535_v52 = vmul.f32 %v3478_v16, %v4981_v14  ;;  %v2456_v48 = vpop.f32.mrb[69].mxu0  ;;  %v3754_v16 = vld [vmem:[%s3951_s30 + $0xf0] sm:$0xff] }
 0x404   : > { %2665 = vst [vmem:[%s5001_s26 + $0x90] sm:$0xff] %v2633_v3  ;;  %v2603_v43 = vadd.f32 %v3744_v15, %v2571_v62  ;;  %v2534_v2 = vmul.f32 %v4981_v14, %v2456_v48  ;;  %v3753_v3 = vld [vmem:[%s3951_s30 + $0xf8] sm:$0xff]  ;;  %s3822_s30 = smov [#allocation2]  }
 0x405   : > { %v2636_v53 = vmax.f32 %v2604_v59, 0.0  ;;  %v2574_v63 = vadd.f32 %v4987_v4, %v2535_v52  ;;  %s3759_s21 = sshll.u32 %s3822_s30, 4  ;;  %s3760_s21 = int_to_ptr.vmem [resolvable:$false] %s3759_s21 }
 0x406   : > { %v2635_v49 = vmax.f32 %v2603_v43, 0.0  ;;  %v2573_v46 = vadd.f32 %v4987_v4, %v2534_v2  ;;  %v3481_v5 = vpop.f32.mrb[70].mxu0  ;;  %s3761_s25 = scalar_lea.vmem %s3760_s21, 8192  ;;  %p3762_p0 = scmp.lt.s32.totalorder %s5126_s28, %s3760_s21 }
 0x407   : > { %2668 = vst [vmem:[%s5001_s26 + $0xa8] sm:$0xff] %v2636_v53  ;;  %v2606_v1 = vadd.f32 %v3745_v61, %v2574_v63  ;;  %v2537_v10 = vmul.f32 %v3481_v5, %v4981_v14  ;;  %v2466_v58 = vpop.f32.mrb[71].mxu0  ;;  %p3763_p1 = scmp.lt.s32.totalorder %s3761_s25, %s3755_s20 }
 0x408   : > { %2667 = vst [vmem:[%s5001_s26 + $0xa0] sm:$0xff] %v2635_v49  ;;  %v2605_v54 = vadd.f32 %v3746_v38, %v2573_v46  ;;  %v2536_v25 = vmul.f32 %v4981_v14, %v2466_v58 }
 0x409   : > { %v2638_v27 = vmax.f32 %v2606_v1, 0.0  ;;  %v2576_v13 = vadd.f32 %v4987_v4, %v2537_v10  ;;  %p3764_p2 = por %p3763_p1, %p3762_p0 }
 0x40a   : > { %v2637_v7 = vmax.f32 %v2605_v54, 0.0  ;;  %v2575_v35 = vadd.f32 %v4987_v4, %v2536_v25  ;;  %v3484_v30 = vpop.f32.mrb[72].mxu0 }
 0x40b   : > { %2670 = vst [vmem:[%s5001_s26 + $0xb8] sm:$0xff] %v2638_v27  ;;  %v2608_v22 = vadd.f32 %v3747_v32, %v2576_v13  ;;  %v2539_v36 = vmul.f32 %v3484_v30, %v4981_v14  ;;  %v2476_v29 = vpop.f32.mrb[73].mxu0  ;;  %p3765_p3 = pnand %p3764_p2, %p3758_p13 }
 0x40c   : > { %2669 = vst [vmem:[%s5001_s26 + $0xb0] sm:$0xff] %v2637_v7  ;;  %v2607_v39 = vadd.f32 %v3748_v42, %v2575_v35  ;;  %v2538_v9 = vmul.f32 %v4981_v14, %v2476_v29 }
 0x40d   : > { %v2640_v23 = vmax.f32 %v2608_v22, 0.0  ;;  %v2578_v33 = vadd.f32 %v4987_v4, %v2539_v36 }
 0x40e   : > { %v2639_v60 = vmax.f32 %v2607_v39, 0.0  ;;  %v2577_v40 = vadd.f32 %v4987_v4, %v2538_v9  ;;  %v3487_v55 = vpop.f32.mrb[74].mxu0 }
 0x40f   : > { %2672 = vst [vmem:[%s5001_s26 + $0xc8] sm:$0xff] %v2640_v23  ;;  %v2610_v6 = vadd.f32 %v3749_v56, %v2578_v33  ;;  %v2541_v8 = vmul.f32 %v3487_v55, %v4981_v14  ;;  %v2486_v44 = vpop.f32.mrb[75].mxu0 }
 0x410   : > { %2671 = vst [vmem:[%s5001_s26 + $0xc0] sm:$0xff] %v2639_v60  ;;  %v2609_v57 = vadd.f32 %v3750_v50, %v2577_v40  ;;  %v2540_v20 = vmul.f32 %v4981_v14, %v2486_v44 }
 0x411   : > { %v2642_v17 = vmax.f32 %v2610_v6, 0.0  ;;  %v2580_v21 = vadd.f32 %v4987_v4, %v2541_v8 }
 0x412   : > { %v2641_v34 = vmax.f32 %v2609_v57, 0.0  ;;  %v2579_v0 = vadd.f32 %v4987_v4, %v2540_v20  ;;  %v3490_v18 = vpop.f32.mrb[76].mxu0 }
 0x413   : > { %2674 = vst [vmem:[%s5001_s26 + $0xd8] sm:$0xff] %v2642_v17  ;;  %v2612_v31 = vadd.f32 %v3751_v19, %v2580_v21  ;;  %v2543_v28 = vmul.f32 %v3490_v18, %v4981_v14  ;;  %v2496_v51 = vpop.f32.mrb[77].mxu0 }
 0x414   : > { %2673 = vst [vmem:[%s5001_s26 + $0xd0] sm:$0xff] %v2641_v34  ;;  %v2611_v12 = vadd.f32 %v3752_v11, %v2579_v0  ;;  %v2542_v26 = vmul.f32 %v4981_v14, %v2496_v51 }
 0x415   : > { %v2644_v45 = vmax.f32 %v2612_v31, 0.0  ;;  %v2582_v37 = vadd.f32 %v4987_v4, %v2543_v28 }
 0x416   : > { %v2643_v47 = vmax.f32 %v2611_v12, 0.0  ;;  %v2581_v24 = vadd.f32 %v4987_v4, %v2542_v26 }
 0x417   : > { %2676 = vst [vmem:[%s5001_s26 + $0xe8] sm:$0xff] %v2644_v45  ;;  %v2614_v62 = vadd.f32 %v3753_v3, %v2582_v37 }
 0x418   : > { %2675 = vst [vmem:[%s5001_s26 + $0xe0] sm:$0xff] %v2643_v47  ;;  %v2613_v41 = vadd.f32 %v3754_v16, %v2581_v24 }
 0x419   : > { %v2646_v59 = vmax.f32 %v2614_v62, 0.0 }
 0x41a   : > { %v2645_v14 = vmax.f32 %v2613_v41, 0.0 }
 0x41b   : > { %2678 = vst [vmem:[%s5001_s26 + $0xf8] sm:$0xff] %v2646_v59 }
 0x41c   : > { %2677 = vst [vmem:[%s5001_s26 + $0xf0] sm:$0xff] %v2645_v14 }
 0x41d   : > { %3768 = shalt.err (!%p3765_p3)
}
 0x41e   : > { %s3769_s18 = scalar_lea.hbm %s5124_s12, 4096  ;;  %s3773_s29 = scalar_lea.hbm %s5183_s10, 8192 }
 0x41f   : > { %p3770_p4 = scmp.ne.s32.totalorder %s5124_s12, %s3769_s18  ;;  %p3774_p9 = scmp.lt.u32.totalorder %s5124_s12, %s5183_s10 }
 0x420   : > { %p3775_p10 = scmp.lt.u32.totalorder %s3773_s29, %s3769_s18  ;;  %p3777_p12 = scmp.lt.u32.totalorder %s3769_s18, %s5124_s12 }
 0x421   : > { %p3771_p7 = pnand %p3770_p4, %p3918_p5 }
 0x422   : > { %p3776_p11 = por %p3775_p10, %p3774_p9 }
 0x423   : > { %p3772_p8 = pneg %p3771_p7 }
 0x424   : > { %p3778_p13 = por %p3777_p12, %p3776_p11 }
 0x426   : > { %p3779_p0 = pnand %p3778_p13, %p3772_p8 }
 0x428   : > { %3782 = shalt.err (!%p3779_p0)
}
 0x429   : > { %s3823_s20 = smov 128   ;;  %s3824_s21 = smov 8  }
 0x42a   : > { %3679 = dma.vmem_to_hbm [thread:$0]  (%p3918_p5), %s5126_s28, 4096, %s5124_s12, %s5132_s17, %s3823_s20, %s3823_s20, %s3824_s21  }
 0x42b PF: > { %p3685_p1 = scmp.ge.s32.totalorder %s3817_s16, 2  ;;  %s2708_s25 = sand.u32 1, %s3805_s13  }
 0x42c   : > { %s2709_s18 = scalar_lea.sflag [#allocation3], %s2708_s25 }
 0x42d   : > { %p3682_p2 = pnand %p3685_p1, %p3922_p6 }
 0x42f   : > { %3800 = dma.done.wait (!%p3682_p2), %s2709_s18, 4096  }
 0x430   : > { %3802 = vsyncadd (!%p3682_p2), %s2709_s18, 4294963200  ;;  %p20_p3 = scmp.ge.s32.totalorder %s3905_s19, 4   ;;  %s5196_s13 = smov %s3809_s14 }
 0x431   : > { %s5197_s14 = smov %s3813_s15  ;;  %s5198_s15 = smov %s3916_s22 }
 0x432   : > { %s5199_s16 = smov %s3905_s19  ;;  %22 = sbr.rel (!%p20_p3) target bundleno = 3 (0x3), region = 97 }
 0x439   :  { %2714 = vsyncpa [#allocation3], 1 }
 0x43a   :  { %2716 = vsyncpa [#allocation3 + $0x1], 1 }

</bundles_post_ra>
